<compile_context>
chip_gen: v5e
topology: v5e:2x2
jax: 0.10.0
libtpu: 0.0.40
codegen_flags: <defaults>
</compile_context>

<pallas_src>
import functools
import math

import jax
import jax.numpy as jnp
from jax.experimental import pallas as pl
from jax.experimental.pallas import tpu as pltpu


def _round_up(x, m):
    return (x + m - 1) // m * m


def _vmem_capacity_bytes():
    try:
        return int(pltpu.get_tpu_info().vmem_capacity_bytes)
    except Exception:
        return 64 * 1024 * 1024  # conservative default (v7x per-core VMEM)


_VMEM_CAP = _vmem_capacity_bytes()
# Scoped-VMEM budget handed to Mosaic: 3/4 of physical, capped at 96 MiB.
#   v5e/v6e (128 MiB) -> 96 MiB, v7x (64 MiB) -> 48 MiB.
VMEM_LIMIT = int(min((_VMEM_CAP * 3) // 4, 96 * 1024 * 1024))
# Working-set budget for deciding whether the fused FFN path fits.
_FFN_FUSED_BUDGET = (VMEM_LIMIT * 3) // 5


def _pick_tile(total, cap):
    """Largest multiple of 128 <= cap that divides `total` (itself a mult of 128)."""
    if total <= cap:
        return total
    t = (cap // 128) * 128
    while t > 128 and total % t != 0:
        t -= 128
    return t


# --------------------------------------------------------------------------
# Tiled matmul + bias (+ optional ReLU): bf16 MXU inputs / f32 accumulation
# --------------------------------------------------------------------------
def _matmul_bias_kernel(x_ref, w_ref, b_ref, o_ref, acc_ref, *, activation):
    @pl.when(pl.program_id(2) == 0)
    def _():
        acc_ref[...] = jnp.zeros_like(acc_ref)

    acc_ref[...] += jnp.dot(x_ref[...], w_ref[...],
                            preferred_element_type=jnp.float32)

    @pl.when(pl.program_id(2) == pl.num_programs(2) - 1)
    def _():
        y = acc_ref[...] + b_ref[...]
        if activation == "relu":
            y = jnp.maximum(y, 0.0)
        o_ref[...] = y.astype(o_ref.dtype)


def linear_pallas(x, w, b, n_out, activation="none", out_dtype=jnp.bfloat16,
                  tm=256, tn_cap=1024, tk_cap=1024):
    """x: (M, K) bf16 activations (unpadded); w: (Kp, Np) bf16 pre-padded;
    b: (1, Np) f32 pre-padded.  Returns (M, n_out) in out_dtype."""
    M, K = x.shape
    Kp, Np = w.shape
    tm = min(tm, _round_up(M, 8))
    tn = _pick_tile(Np, tn_cap)
    tk = _pick_tile(Kp, tk_cap)          # full K when it fits (one k step)
    Mp = _round_up(M, tm)

    xp = x.astype(jnp.bfloat16)
    if Mp != M or Kp != K:
        xp = jnp.pad(xp, ((0, Mp - M), (0, Kp - K)))

    out = pl.pallas_call(
        functools.partial(_matmul_bias_kernel, activation=activation),
        out_shape=jax.ShapeDtypeStruct((Mp, Np), out_dtype),
        grid=(Mp // tm, Np // tn, Kp // tk),
        in_specs=[
            pl.BlockSpec((tm, tk), lambda i, j, k: (i, k)),
            pl.BlockSpec((tk, tn), lambda i, j, k: (k, j)),
            pl.BlockSpec((1, tn), lambda i, j, k: (0, j)),
        ],
        out_specs=pl.BlockSpec((tm, tn), lambda i, j, k: (i, j)),
        scratch_shapes=[pltpu.VMEM((tm, tn), jnp.float32)],
        compiler_params=pltpu.CompilerParams(
            dimension_semantics=("parallel", "parallel", "arbitrary"),
            vmem_limit_bytes=VMEM_LIMIT,
        ),
    )(xp, w, b)
    return out[:M, :n_out]


# --------------------------------------------------------------------------
# Fused FFN: relu(x @ w1 + b1) @ w2 + b2, intermediate kept in VMEM
# --------------------------------------------------------------------------
def _ffn_kernel(x_ref, w1_ref, b1_ref, w2_ref, b2_ref, o_ref):
    h = jnp.dot(x_ref[...], w1_ref[...], preferred_element_type=jnp.float32)
    h = jnp.maximum(h + b1_ref[...], 0.0)
    y = jnp.dot(h.astype(jnp.bfloat16), w2_ref[...],
                preferred_element_type=jnp.float32)
    o_ref[...] = (y + b2_ref[...]).astype(o_ref.dtype)


def ffn_pallas(x, w1, b1, w2, b2, n_out, tm=256):
    """x: (M, D) bf16; w1: (Dp, Fp) bf16; w2: (Fp, Dp) bf16 (pre-padded)."""
    M, D = x.shape
    Dp, Fp = w1.shape
    tm = min(tm, _round_up(M, 8))

    # bf16 weight slabs (default double-buffered) + activation tiles + f32 h.
    weight_bytes = 2 * 2 * (Dp * Fp + Fp * Dp)
    act_bytes = 2 * 2 * (tm * Dp * 2) + tm * Fp * 4 + tm * Dp * 4
    if weight_bytes + act_bytes > _FFN_FUSED_BUDGET:
        # TODO(synk): pipeline_mode=pl.Buffered(1) on the constant weight specs
        # would roughly double fused-path coverage on v7x; fall back for now.
        h = linear_pallas(x, w1, b1, n_out=Fp, activation="relu")
        return linear_pallas(h, w2, b2, n_out=n_out)

    Mp = _round_up(M, tm)
    xp = x.astype(jnp.bfloat16)
    if Mp != M or Dp != D:
        xp = jnp.pad(xp, ((0, Mp - M), (0, Dp - D)))

    out = pl.pallas_call(
        _ffn_kernel,
        out_shape=jax.ShapeDtypeStruct((Mp, Dp), jnp.bfloat16),
        grid=(Mp // tm,),
        in_specs=[
            pl.BlockSpec((tm, Dp), lambda i: (i, 0)),
            pl.BlockSpec((Dp, Fp), lambda i: (0, 0)),
            pl.BlockSpec((1, Fp), lambda i: (0, 0)),
            pl.BlockSpec((Fp, Dp), lambda i: (0, 0)),
            pl.BlockSpec((1, Dp), lambda i: (0, 0)),
        ],
        out_specs=pl.BlockSpec((tm, Dp), lambda i: (i, 0)),
        compiler_params=pltpu.CompilerParams(
            dimension_semantics=("parallel",),
            vmem_limit_bytes=VMEM_LIMIT,
        ),
    )(xp, w1, b1, w2, b2)
    return out[:M, :n_out]


# --------------------------------------------------------------------------
# LayerNorm with the residual add fused in: LN(x + res) * g + b  (f32 stats)
# --------------------------------------------------------------------------
def _layernorm_res_kernel(x_ref, r_ref, g_ref, b_ref, o_ref):
    x = x_ref[...].astype(jnp.float32) + r_ref[...].astype(jnp.float32)
    mu = jnp.mean(x, axis=-1, keepdims=True)
    var = jnp.mean(jnp.square(x - mu), axis=-1, keepdims=True)
    y = (x - mu) * jax.lax.rsqrt(var + 1e-5) * g_ref[...] + b_ref[...]
    o_ref[...] = y.astype(o_ref.dtype)


def layernorm_res_pallas(x, res, g, b, tm=256):
    """x, res: (M, D) bf16; g, b: (1, D) f32.  Returns bf16 LN(x + res)."""
    M, D = x.shape
    tm = min(tm, _round_up(M, 8))
    Mp = _round_up(M, tm)
    xp = x if Mp == M else jnp.pad(x, ((0, Mp - M), (0, 0)))
    rp = res if Mp == M else jnp.pad(res, ((0, Mp - M), (0, 0)))
    out = pl.pallas_call(
        _layernorm_res_kernel,
        out_shape=jax.ShapeDtypeStruct((Mp, D), jnp.bfloat16),
        grid=(Mp // tm,),
        in_specs=[
            pl.BlockSpec((tm, D), lambda i: (i, 0)),
            pl.BlockSpec((tm, D), lambda i: (i, 0)),
            pl.BlockSpec((1, D), lambda i: (0, 0)),
            pl.BlockSpec((1, D), lambda i: (0, 0)),
        ],
        out_specs=pl.BlockSpec((tm, D), lambda i: (i, 0)),
        compiler_params=pltpu.CompilerParams(
            dimension_semantics=("parallel",),
            vmem_limit_bytes=VMEM_LIMIT,
        ),
    )(xp, rp, g, b)
    return out[:M]


# --------------------------------------------------------------------------
# Fused multi-head attention, lane-dense (B, T, D) I/O; head split in-kernel.
# Q is pre-scaled by 1/sqrt(dh) (folded into the Q projection weights).
# --------------------------------------------------------------------------
def _attention_kernel(q_ref, k_ref, v_ref, m_ref, o_ref, *rest,
                      n_heads, dh, mask_rank, with_probs):
    q = q_ref[0]                                   # (Tq, D) bf16, pre-scaled
    k = k_ref[0]                                   # (Tk, D) bf16
    v = v_ref[0]                                   # (Tk, D) bf16
    mask = m_ref[...] if mask_rank == 2 else m_ref[0]   # (Tq, Tk) additive f32

    for h in range(n_heads):
        lo, hi = h * dh, (h + 1) * dh
        qh, kh, vh = q[:, lo:hi], k[:, lo:hi], v[:, lo:hi]
        s = jax.lax.dot_general(qh, kh, (((1,), (1,)), ((), ())),
                                preferred_element_type=jnp.float32)
        s = s + mask
        s_max = jnp.max(s, axis=-1, keepdims=True)
        e = jnp.exp(s - s_max)
        denom = jnp.sum(e, axis=-1, keepdims=True)
        if with_probs:
            p = e / denom                          # exact: these probs are returned
            rest[0][0, h] = p
        else:
            p = e * pl.reciprocal(denom, approx=True)
        o = jnp.dot(p.astype(jnp.bfloat16), vh,
                    preferred_element_type=jnp.float32)
        o_ref[0, :, lo:hi] = o.astype(o_ref.dtype)


def attention_pallas(q, k, v, mask, n_heads, with_probs=False):
    """q: (B, Tq, D), k/v: (B, Tk, D) bf16 (heads packed along the lane dim);
    mask: (Tq, Tk) shared or (B, Tq, Tk) per-batch, additive f32."""
    B, Tq, D = q.shape
    Tk = k.shape[1]
    dh = D // n_heads
    mask_rank = mask.ndim

    kernel = functools.partial(_attention_kernel, n_heads=n_heads, dh=dh,
                               mask_rank=mask_rank, with_probs=with_probs)

    mask_spec = (pl.BlockSpec((Tq, Tk), lambda b: (0, 0)) if mask_rank == 2
                 else pl.BlockSpec((1, Tq, Tk), lambda b: (b, 0, 0)))
    in_specs = [
        pl.BlockSpec((1, Tq, D), lambda b: (b, 0, 0)),
        pl.BlockSpec((1, Tk, D), lambda b: (b, 0, 0)),
        pl.BlockSpec((1, Tk, D), lambda b: (b, 0, 0)),
        mask_spec,
    ]
    if with_probs:
        out_shape = (jax.ShapeDtypeStruct((B, Tq, D), jnp.bfloat16),
                     jax.ShapeDtypeStruct((B, n_heads, Tq, Tk), jnp.float32))
        out_specs = (pl.BlockSpec((1, Tq, D), lambda b: (b, 0, 0)),
                     pl.BlockSpec((1, n_heads, Tq, Tk), lambda b: (b, 0, 0, 0)))
    else:
        out_shape = jax.ShapeDtypeStruct((B, Tq, D), jnp.bfloat16)
        out_specs = pl.BlockSpec((1, Tq, D), lambda b: (b, 0, 0))

    res = pl.pallas_call(
        kernel,
        out_shape=out_shape,
        grid=(B,),
        in_specs=in_specs,
        out_specs=out_specs,
        compiler_params=pltpu.CompilerParams(
            dimension_semantics=("parallel",),
            vmem_limit_bytes=VMEM_LIMIT,
        ),
    )(q.astype(jnp.bfloat16), k.astype(jnp.bfloat16), v.astype(jnp.bfloat16),
      mask.astype(jnp.float32))

    if with_probs:
        return res[0], res[1]
    return res, None


# --------------------------------------------------------------------------
# Model glue (reshapes / parameter plumbing) in plain JAX
# --------------------------------------------------------------------------
def multi_head_attention(x_q, x_kv, mask, p, n_heads, is_self, need_score):
    """x_q: (B, Tq, D), x_kv: (B, Tk, D) bf16; mask additive."""
    B, Tq, D = x_q.shape
    Tk = x_kv.shape[1]

    if is_self:
        qkv = linear_pallas(x_q.reshape(B * Tq, D), p["w_qkv"], p["b_qkv"],
                            n_out=3 * D).reshape(B, Tq, 3 * D)
        q, k, v = jnp.split(qkv, 3, axis=-1)
    else:
        q = linear_pallas(x_q.reshape(B * Tq, D), p["wq"], p["bq"],
                          n_out=D).reshape(B, Tq, D)
        kv = linear_pallas(x_kv.reshape(B * Tk, D), p["w_kv"], p["b_kv"],
                           n_out=2 * D).reshape(B, Tk, 2 * D)
        k, v = jnp.split(kv, 2, axis=-1)

    out, probs = attention_pallas(q, k, v, mask, n_heads, with_probs=need_score)
    out = linear_pallas(out.reshape(B * Tq, D), p["wo"], p["bo"],
                        n_out=D).reshape(B, Tq, D)
    return out, probs  # probs: (B, H, Tq, Tk) f32 or None


def decoder_layer(src, tgt, src_mask, tgt_mask, p, n_heads, need_score):
    B, Tt, D = tgt.shape
    # masked self-attention + residual + LN (residual fused into LN kernel)
    sa, _ = multi_head_attention(tgt, tgt, tgt_mask, p["self_attn"],
                                 n_heads, True, False)
    tgt = layernorm_res_pallas(tgt.reshape(B * Tt, D), sa.reshape(B * Tt, D),
                               p["ln1_g"], p["ln1_b"]).reshape(B, Tt, D)
    # cross-attention over encoder output + residual + LN
    ca, score = multi_head_attention(tgt, src, src_mask, p["cross_attn"],
                                     n_heads, False, need_score)
    tgt = layernorm_res_pallas(tgt.reshape(B * Tt, D), ca.reshape(B * Tt, D),
                               p["ln2_g"], p["ln2_b"]).reshape(B, Tt, D)
    # fused position-wise FFN + residual + LN
    h = ffn_pallas(tgt.reshape(B * Tt, D), p["w1"], p["b1"], p["w2"], p["b2"],
                   n_out=D)
    tgt = layernorm_res_pallas(tgt.reshape(B * Tt, D), h,
                               p["ln3_g"], p["ln3_b"]).reshape(B, Tt, D)
    return tgt, score


def decoder_forward(params, tgt_ids, src, tgt_mask, src_mask, n_heads, vocab_size):
    """tgt_ids: (B, Tt) int32; src: (B, Ts, D) encoder output.
    Masks additive (0.0 keep / -1e9 drop): (Tt, Tt)/(Tt, Ts) or per-batch 3-D."""
    B, Tt = tgt_ids.shape
    x = (jnp.take(params["embedding"], tgt_ids, axis=0).astype(jnp.float32)
         + params["pos_encoding"][:Tt][None, :, :]).astype(jnp.bfloat16)
    src = src.astype(jnp.bfloat16)

    score = None
    n_layers = len(params["layers"])
    for li, lp in enumerate(params["layers"]):
        # only the last layer's cross-attention probabilities are returned ->
        # only that attention call writes the probability tensor to HBM.
        x, s = decoder_layer(src, x, src_mask, tgt_mask, lp, n_heads,
                             need_score=(li == n_layers - 1))
        if s is not None:
            score = s

    D = x.shape[-1]
    out = linear_pallas(x.reshape(B * Tt, D), params["w_out"], params["b_out"],
                        n_out=vocab_size, out_dtype=jnp.float32)
    return out.reshape(B, Tt, vocab_size), score


# --------------------------------------------------------------------------
# Deterministic parameter init: weights pre-padded to x128 and stored as bf16
# --------------------------------------------------------------------------
def make_pos_encoding(max_len, d_model):
    pos = jnp.arange(max_len, dtype=jnp.float32)[:, None]
    i = jnp.arange(0, d_model, 2, dtype=jnp.float32)
    div = jnp.exp(-math.log(10000.0) * i / d_model)
    pe = jnp.zeros((max_len, d_model), jnp.float32)
    pe = pe.at[:, 0::2].set(jnp.sin(pos * div))
    pe = pe.at[:, 1::2].set(jnp.cos(pos * div))
    return pe


def _pad_w(w):
    K, N = w.shape
    Kp, Np = _round_up(K, 128), _round_up(N, 128)
    return jnp.pad(w, ((0, Kp - K), (0, Np - N))).astype(jnp.bfloat16)


def _pad_b(b):
    N = b.shape[0]
    Np = _round_up(N, 128)
    return jnp.pad(b, (0, Np - N)).reshape(1, Np).astype(jnp.float32)


def init_params(key, n_layers, vocab, max_len, n_heads, d_model, ff_dim):
    keys = iter(jax.random.split(key, 16 + n_layers * 32))
    dh = d_model // n_heads
    q_scale = 1.0 / math.sqrt(dh)

    def dense(din, dout):
        lim = 1.0 / math.sqrt(din)
        w = jax.random.uniform(next(keys), (din, dout), jnp.float32, -lim, lim)
        b = jax.random.uniform(next(keys), (dout,), jnp.float32, -lim, lim)
        return w, b

    def self_attn_params():
        w_qkv, b_qkv = dense(d_model, 3 * d_model)   # fused Q,K,V projection
        # fold the 1/sqrt(dh) attention scale into the Q projection
        w_qkv = w_qkv.at[:, :d_model].multiply(q_scale)
        b_qkv = b_qkv.at[:d_model].multiply(q_scale)
        wo, bo = dense(d_model, d_model)
        return dict(w_qkv=_pad_w(w_qkv), b_qkv=_pad_b(b_qkv),
                    wo=_pad_w(wo), bo=_pad_b(bo))

    def cross_attn_params():
        wq, bq = dense(d_model, d_model)
        wq, bq = wq * q_scale, bq * q_scale          # fold attention scale into Q
        w_kv, b_kv = dense(d_model, 2 * d_model)     # fused K,V projection
        wo, bo = dense(d_model, d_model)
        return dict(wq=_pad_w(wq), bq=_pad_b(bq),
                    w_kv=_pad_w(w_kv), b_kv=_pad_b(b_kv),
                    wo=_pad_w(wo), bo=_pad_b(bo))

    layers = []
    for _ in range(n_layers):
        w1, b1 = dense(d_model, ff_dim)
        w2, b2 = dense(ff_dim, d_model)
        layers.append(dict(
            self_attn=self_attn_params(),
            cross_attn=cross_attn_params(),
            w1=_pad_w(w1), b1=_pad_b(b1), w2=_pad_w(w2), b2=_pad_b(b2),
            ln1_g=jnp.ones((1, d_model), jnp.float32), ln1_b=jnp.zeros((1, d_model), jnp.float32),
            ln2_g=jnp.ones((1, d_model), jnp.float32), ln2_b=jnp.zeros((1, d_model), jnp.float32),
            ln3_g=jnp.ones((1, d_model), jnp.float32), ln3_b=jnp.zeros((1, d_model), jnp.float32),
        ))

    emb = jax.random.normal(next(keys), (vocab, d_model), jnp.float32).astype(jnp.bfloat16)
    w_out, b_out = dense(d_model, vocab)
    return dict(
        embedding=emb,
        pos_encoding=make_pos_encoding(max_len, d_model),
        layers=layers,
        w_out=_pad_w(w_out), b_out=_pad_b(b_out),
    )


# --------------------------------------------------------------------------
if __name__ == "__main__":
    B, Tt, Ts = 2, 8, 8
    n_layers, vocab, max_len, n_heads, d_model, ff_dim = 2, 50, 16, 4, 32, 64

    key = jax.random.PRNGKey(0)
    kp, kt, ks = jax.random.split(key, 3)

    params = init_params(kp, n_layers, vocab, max_len, n_heads, d_model, ff_dim)
    tgt_ids = jax.random.randint(kt, (B, Tt), 0, vocab)
    src = jax.random.normal(ks, (B, Ts, d_model), jnp.float32)

    # additive masks, shared across the batch (2-D -> constant index_map DMA):
    # causal for the target self-attention, all-visible cross-attention.
    tgt_mask = jnp.where(jnp.tril(jnp.ones((Tt, Tt), dtype=bool)),
                         0.0, -1e9).astype(jnp.float32)
    src_mask = jnp.zeros((Tt, Ts), jnp.float32)

    fwd = jax.jit(functools.partial(decoder_forward, n_heads=n_heads,
                                    vocab_size=vocab))
    out, score = fwd(params, tgt_ids, src, tgt_mask, src_mask)
    jax.block_until_ready((out, score))

    assert out.shape == (B, Tt, vocab)
    assert score.shape == (B, n_heads, Tt, Ts)
    print("KERNEL_OK")
</pallas_src>

<mosaic_0001>
module attributes {stable_mosaic.version = 11 : i64} {
  func.func @_matmul_bias_kernel(%arg0: i32, %arg1: i32, %arg2: i32, %arg3: memref<16x128xbf16, #tpu.memory_space<vmem>>, %arg4: memref<128x128xbf16, #tpu.memory_space<vmem>>, %arg5: memref<1x128xf32, #tpu.memory_space<vmem>>, %arg6: memref<16x128xbf16, #tpu.memory_space<vmem>>, %arg7: memref<16x128xf32, #tpu.memory_space<vmem>>) attributes {dimension_semantics = [#tpu.dimension_semantics<parallel>, #tpu.dimension_semantics<parallel>, #tpu.dimension_semantics<arbitrary>], iteration_bounds = array<i64: 1, 1, 1>, scalar_prefetch = 0 : i64, scratch_operands = 1 : i64, tpu.core_type = #tpu.core_type<tc>, window_params = [{transform_indices = @transform_0, window_bounds = array<i64: 16, 128>}, {transform_indices = @transform_1, window_bounds = array<i64: 128, 128>}, {transform_indices = @transform_2, window_bounds = array<i64: 1, 128>}, {transform_indices = @transform_3, window_bounds = array<i64: 16, 128>}]} {
    %c0_i32 = arith.constant 0 : i32
    %0 = arith.cmpi eq, %arg2, %c0_i32 : i32
    %1 = arith.extui %0 : i1 to i32
    %c0_i32_0 = arith.constant 0 : i32
    %2 = arith.cmpi ne, %1, %c0_i32_0 : i32
    scf.if %2 {
      %cst_10 = arith.constant 0.000000e+00 : f32
      %12 = vector.broadcast %cst_10 : f32 to vector<16x128xf32>
      %c0_11 = arith.constant 0 : index
      %c0_12 = arith.constant 0 : index
      %13 = vector.load %arg7[%c0_11, %c0_12] : memref<16x128xf32, #tpu.memory_space<vmem>>, vector<16x128xf32>
      tpu.vector_store %arg7[%c0_11, %c0_12], %12 {strides = array<i32>} : memref<16x128xf32, #tpu.memory_space<vmem>>, vector<16x128xf32>,
    } else {
    }
    %c0 = arith.constant 0 : index
    %c0_1 = arith.constant 0 : index
    %3 = vector.load %arg7[%c0, %c0_1] : memref<16x128xf32, #tpu.memory_space<vmem>>, vector<16x128xf32>
    %c0_2 = arith.constant 0 : index
    %c0_3 = arith.constant 0 : index
    %4 = vector.load %arg3[%c0_2, %c0_3] : memref<16x128xbf16, #tpu.memory_space<vmem>>, vector<16x128xbf16>
    %c0_4 = arith.constant 0 : index
    %c0_5 = arith.constant 0 : index
    %5 = vector.load %arg4[%c0_4, %c0_5] : memref<128x128xbf16, #tpu.memory_space<vmem>>, vector<128x128xbf16>
    %cst = arith.constant dense<0.000000e+00> : vector<16x128xf32>
    %6 = tpu.matmul %4, %5, %cst {dimension_numbers = #tpu.dot_dimension_numbers<[1], [0], [0], [1], [0, 0, 1, 1], [], []>} : vector<16x128xbf16>, vector<128x128xbf16>, vector<16x128xf32> -> vector<16x128xf32>
    %7 = arith.addf %3, %6 : vector<16x128xf32>
    %c0_6 = arith.constant 0 : index
    %c0_7 = arith.constant 0 : index
    %8 = vector.load %arg7[%c0_6, %c0_7] : memref<16x128xf32, #tpu.memory_space<vmem>>, vector<16x128xf32>
    tpu.vector_store %arg7[%c0_6, %c0_7], %7 {strides = array<i32>} : memref<16x128xf32, #tpu.memory_space<vmem>>, vector<16x128xf32>,
    %c0_i32_8 = arith.constant 0 : i32
    %9 = arith.cmpi eq, %arg2, %c0_i32_8 : i32
    %10 = arith.extui %9 : i1 to i32
    %c0_i32_9 = arith.constant 0 : i32
    %11 = arith.cmpi ne, %10, %c0_i32_9 : i32
    scf.if %11 {
      %c0_10 = arith.constant 0 : index
      %c0_11 = arith.constant 0 : index
      %12 = vector.load %arg7[%c0_10, %c0_11] : memref<16x128xf32, #tpu.memory_space<vmem>>, vector<16x128xf32>
      %c0_12 = arith.constant 0 : index
      %c0_13 = arith.constant 0 : index
      %13 = vector.load %arg5[%c0_12, %c0_13] : memref<1x128xf32, #tpu.memory_space<vmem>>, vector<1x128xf32>
      %14 = vector.broadcast %13 : vector<1x128xf32> to vector<16x128xf32>
      %15 = arith.addf %12, %14 : vector<16x128xf32>
      %16 = arith.truncf %15 : vector<16x128xf32> to vector<16x128xbf16>
      %c0_14 = arith.constant 0 : index
      %c0_15 = arith.constant 0 : index
      %17 = vector.load %arg6[%c0_14, %c0_15] : memref<16x128xbf16, #tpu.memory_space<vmem>>, vector<16x128xbf16>
      tpu.vector_store %arg6[%c0_14, %c0_15], %16 {strides = array<i32>} : memref<16x128xbf16, #tpu.memory_space<vmem>>, vector<16x128xbf16>,
    } else {
    }
    return
  }
  func.func @transform_0(%arg0: i32, %arg1: i32, %arg2: i32) -> (i32, i32) {
    %c0_i32 = arith.constant 0 : i32
    return %arg0, %arg2 : i32, i32
  }
  func.func @transform_1(%arg0: i32, %arg1: i32, %arg2: i32) -> (i32, i32) {
    %c0_i32 = arith.constant 0 : i32
    return %arg2, %arg1 : i32, i32
  }
  func.func @transform_2(%arg0: i32, %arg1: i32, %arg2: i32) -> (i32, i32) {
    %c0_i32 = arith.constant 0 : i32
    %c0_i32_0 = arith.constant 0 : i32
    return %c0_i32, %arg1 : i32, i32
  }
  func.func @transform_3(%arg0: i32, %arg1: i32, %arg2: i32) -> (i32, i32) {
    %c0_i32 = arith.constant 0 : i32
    return %arg0, %arg1 : i32, i32
  }
}

module attributes {stable_mosaic.version = 11 : i64} {
  func.func @_matmul_bias_kernel(%arg0: i32, %arg1: i32, %arg2: i32, %arg3: memref<16x128xbf16, #tpu.memory_space<vmem>>, %arg4: memref<128x128xbf16, #tpu.memory_space<vmem>>, %arg5: memref<1x128xf32, #tpu.memory_space<vmem>>, %arg6: memref<16x128xbf16, #tpu.memory_space<vmem>>, %arg7: memref<16x128xf32, #tpu.memory_space<vmem>>) attributes {dimension_semantics = [#tpu.dimension_semantics<parallel>, #tpu.dimension_semantics<parallel>, #tpu.dimension_semantics<arbitrary>], iteration_bounds = array<i64: 1, 1, 1>, scalar_prefetch = 0 : i64, scratch_operands = 1 : i64, tpu.core_type = #tpu.core_type<tc>, window_params = [{transform_indices = @transform_0, window_bounds = array<i64: 16, 128>}, {transform_indices = @transform_1, window_bounds = array<i64: 128, 128>}, {transform_indices = @transform_2, window_bounds = array<i64: 1, 128>}, {transform_indices = @transform_3, window_bounds = array<i64: 16, 128>}]} {
    %c0_i32 = arith.constant 0 : i32
    %0 = arith.cmpi eq, %arg2, %c0_i32 : i32
    %1 = arith.extui %0 : i1 to i32
    %c0_i32_0 = arith.constant 0 : i32
    %2 = arith.cmpi ne, %1, %c0_i32_0 : i32
    scf.if %2 {
      %cst_10 = arith.constant 0.000000e+00 : f32
      %12 = vector.broadcast %cst_10 : f32 to vector<16x128xf32>
      %c0_11 = arith.constant 0 : index
      %c0_12 = arith.constant 0 : index
      %13 = vector.load %arg7[%c0_11, %c0_12] : memref<16x128xf32, #tpu.memory_space<vmem>>, vector<16x128xf32>
      tpu.vector_store %arg7[%c0_11, %c0_12], %12 {strides = array<i32>} : memref<16x128xf32, #tpu.memory_space<vmem>>, vector<16x128xf32>,
    } else {
    }
    %c0 = arith.constant 0 : index
    %c0_1 = arith.constant 0 : index
    %3 = vector.load %arg7[%c0, %c0_1] : memref<16x128xf32, #tpu.memory_space<vmem>>, vector<16x128xf32>
    %c0_2 = arith.constant 0 : index
    %c0_3 = arith.constant 0 : index
    %4 = vector.load %arg3[%c0_2, %c0_3] : memref<16x128xbf16, #tpu.memory_space<vmem>>, vector<16x128xbf16>
    %c0_4 = arith.constant 0 : index
    %c0_5 = arith.constant 0 : index
    %5 = vector.load %arg4[%c0_4, %c0_5] : memref<128x128xbf16, #tpu.memory_space<vmem>>, vector<128x128xbf16>
    %cst = arith.constant dense<0.000000e+00> : vector<16x128xf32>
    %6 = tpu.matmul %4, %5, %cst {dimension_numbers = #tpu.dot_dimension_numbers<[1], [0], [0], [1], [0, 0, 1, 1], [], []>} : vector<16x128xbf16>, vector<128x128xbf16>, vector<16x128xf32> -> vector<16x128xf32>
    %7 = arith.addf %3, %6 : vector<16x128xf32>
    %c0_6 = arith.constant 0 : index
    %c0_7 = arith.constant 0 : index
    %8 = vector.load %arg7[%c0_6, %c0_7] : memref<16x128xf32, #tpu.memory_space<vmem>>, vector<16x128xf32>
    tpu.vector_store %arg7[%c0_6, %c0_7], %7 {strides = array<i32>} : memref<16x128xf32, #tpu.memory_space<vmem>>, vector<16x128xf32>,
    %c0_i32_8 = arith.constant 0 : i32
    %9 = arith.cmpi eq, %arg2, %c0_i32_8 : i32
    %10 = arith.extui %9 : i1 to i32
    %c0_i32_9 = arith.constant 0 : i32
    %11 = arith.cmpi ne, %10, %c0_i32_9 : i32
    scf.if %11 {
      %c0_10 = arith.constant 0 : index
      %c0_11 = arith.constant 0 : index
      %12 = vector.load %arg7[%c0_10, %c0_11] : memref<16x128xf32, #tpu.memory_space<vmem>>, vector<16x128xf32>
      %c0_12 = arith.constant 0 : index
      %c0_13 = arith.constant 0 : index
      %13 = vector.load %arg5[%c0_12, %c0_13] : memref<1x128xf32, #tpu.memory_space<vmem>>, vector<1x128xf32>
      %14 = vector.broadcast %13 : vector<1x128xf32> to vector<16x128xf32>
      %15 = arith.addf %12, %14 : vector<16x128xf32>
      %16 = arith.truncf %15 : vector<16x128xf32> to vector<16x128xbf16>
      %c0_14 = arith.constant 0 : index
      %c0_15 = arith.constant 0 : index
      %17 = vector.load %arg6[%c0_14, %c0_15] : memref<16x128xbf16, #tpu.memory_space<vmem>>, vector<16x128xbf16>
      tpu.vector_store %arg6[%c0_14, %c0_15], %16 {strides = array<i32>} : memref<16x128xbf16, #tpu.memory_space<vmem>>, vector<16x128xbf16>,
    } else {
    }
    return
  }
  func.func @transform_0(%arg0: i32, %arg1: i32, %arg2: i32) -> (i32, i32) {
    %c0_i32 = arith.constant 0 : i32
    return %arg0, %arg2 : i32, i32
  }
  func.func @transform_1(%arg0: i32, %arg1: i32, %arg2: i32) -> (i32, i32) {
    %c0_i32 = arith.constant 0 : i32
    return %arg2, %arg1 : i32, i32
  }
  func.func @transform_2(%arg0: i32, %arg1: i32, %arg2: i32) -> (i32, i32) {
    %c0_i32 = arith.constant 0 : i32
    %c0_i32_0 = arith.constant 0 : i32
    return %c0_i32, %arg1 : i32, i32
  }
  func.func @transform_3(%arg0: i32, %arg1: i32, %arg2: i32) -> (i32, i32) {
    %c0_i32 = arith.constant 0 : i32
    return %arg0, %arg1 : i32, i32
  }
}

module attributes {stable_mosaic.version = 11 : i64} {
  func.func @_attention_kernel(%arg0: i32, %arg1: memref<1x8x32xbf16, #tpu.memory_space<vmem>>, %arg2: memref<1x8x32xbf16, #tpu.memory_space<vmem>>, %arg3: memref<1x8x32xbf16, #tpu.memory_space<vmem>>, %arg4: memref<8x8xf32, #tpu.memory_space<vmem>>, %arg5: memref<1x8x32xbf16, #tpu.memory_space<vmem>>) attributes {dimension_semantics = [#tpu.dimension_semantics<parallel>], iteration_bounds = array<i64: 2>, scalar_prefetch = 0 : i64, scratch_operands = 0 : i64, tpu.core_type = #tpu.core_type<tc>, window_params = [{transform_indices = @transform_0, window_bounds = array<i64: 1, 8, 32>}, {transform_indices = @transform_1, window_bounds = array<i64: 1, 8, 32>}, {transform_indices = @transform_2, window_bounds = array<i64: 1, 8, 32>}, {pipeline_mode = #tpu.pipeline_mode<synchronous>, transform_indices = @transform_3, window_bounds = array<i64: 8, 8>}, {transform_indices = @transform_4, window_bounds = array<i64: 1, 8, 32>}]} {
    %c0 = arith.constant 0 : index
    %c0_0 = arith.constant 0 : index
    %c0_1 = arith.constant 0 : index
    %0 = vector.load %arg1[%c0, %c0_0, %c0_1] : memref<1x8x32xbf16, #tpu.memory_space<vmem>>, vector<1x8x32xbf16>
    %1 = vector.shape_cast %0 : vector<1x8x32xbf16> to vector<8x32xbf16>
    %c0_2 = arith.constant 0 : index
    %c0_3 = arith.constant 0 : index
    %c0_4 = arith.constant 0 : index
    %2 = vector.load %arg2[%c0_2, %c0_3, %c0_4] : memref<1x8x32xbf16, #tpu.memory_space<vmem>>, vector<1x8x32xbf16>
    %3 = vector.shape_cast %2 : vector<1x8x32xbf16> to vector<8x32xbf16>
    %c0_5 = arith.constant 0 : index
    %c0_6 = arith.constant 0 : index
    %c0_7 = arith.constant 0 : index
    %4 = vector.load %arg3[%c0_5, %c0_6, %c0_7] : memref<1x8x32xbf16, #tpu.memory_space<vmem>>, vector<1x8x32xbf16>
    %5 = vector.shape_cast %4 : vector<1x8x32xbf16> to vector<8x32xbf16>
    %c0_8 = arith.constant 0 : index
    %c0_9 = arith.constant 0 : index
    %6 = vector.load %arg4[%c0_8, %c0_9] : memref<8x8xf32, #tpu.memory_space<vmem>>, vector<8x8xf32>
    %7 = vector.extract_strided_slice %1 {offsets = [0, 0], sizes = [8, 8], strides = [1, 1]} : vector<8x32xbf16> to vector<8x8xbf16>
    %8 = vector.extract_strided_slice %3 {offsets = [0, 0], sizes = [8, 8], strides = [1, 1]} : vector<8x32xbf16> to vector<8x8xbf16>
    %9 = vector.extract_strided_slice %5 {offsets = [0, 0], sizes = [8, 8], strides = [1, 1]} : vector<8x32xbf16> to vector<8x8xbf16>
    %cst = arith.constant dense<0.000000e+00> : vector<8x8xf32>
    %10 = tpu.matmul %7, %8, %cst {dimension_numbers = #tpu.dot_dimension_numbers<[1], [1], [0], [0], [0, 0, 1, 0], [], []>} : vector<8x8xbf16>, vector<8x8xbf16>, vector<8x8xf32> -> vector<8x8xf32>
    %11 = arith.addf %10, %6 : vector<8x8xf32>
    %cst_10 = arith.constant dense<0xFF800000> : vector<8xf32>
    %12 = vector.multi_reduction <maximumf>, %11, %cst_10 [1] : vector<8x8xf32> to vector<8xf32>
    %13 = vector.shape_cast %12 : vector<8xf32> to vector<8x1xf32>
    %14 = vector.broadcast %13 : vector<8x1xf32> to vector<8x8xf32>
    %15 = arith.subf %11, %14 : vector<8x8xf32>
    %16 = math.exp %15 : vector<8x8xf32>
    %cst_11 = arith.constant dense<0.000000e+00> : vector<8xf32>
    %17 = vector.multi_reduction <add>, %16, %cst_11 [1] : vector<8x8xf32> to vector<8xf32>
    %18 = vector.shape_cast %17 : vector<8xf32> to vector<8x1xf32>
    %19 = tpu.reciprocal %18 {approx = true} : vector<8x1xf32> -> vector<8x1xf32>
    %20 = vector.broadcast %19 : vector<8x1xf32> to vector<8x8xf32>
    %21 = arith.mulf %16, %20 : vector<8x8xf32>
    %22 = arith.truncf %21 : vector<8x8xf32> to vector<8x8xbf16>
    %cst_12 = arith.constant dense<0.000000e+00> : vector<8x8xf32>
    %23 = tpu.matmul %22, %9, %cst_12 {dimension_numbers = #tpu.dot_dimension_numbers<[1], [0], [0], [1], [0, 0, 1, 1], [], []>} : vector<8x8xbf16>, vector<8x8xbf16>, vector<8x8xf32> -> vector<8x8xf32>
    %24 = arith.truncf %23 : vector<8x8xf32> to vector<8x8xbf16>
    %c0_13 = arith.constant 0 : index
    %c0_14 = arith.constant 0 : index
    %c0_15 = arith.constant 0 : index
    %25 = vector.load %arg5[%c0_13, %c0_14, %c0_15] : memref<1x8x32xbf16, #tpu.memory_space<vmem>>, vector<1x8x8xbf16>
    %26 = vector.shape_cast %25 : vector<1x8x8xbf16> to vector<8x8xbf16>
    %27 = vector.shape_cast %24 : vector<8x8xbf16> to vector<1x8x8xbf16>
    tpu.vector_store %arg5[%c0_13, %c0_14, %c0_15], %27 {strides = array<i32>} : memref<1x8x32xbf16, #tpu.memory_space<vmem>>, vector<1x8x8xbf16>,
    %28 = vector.extract_strided_slice %1 {offsets = [0, 8], sizes = [8, 8], strides = [1, 1]} : vector<8x32xbf16> to vector<8x8xbf16>
    %29 = vector.extract_strided_slice %3 {offsets = [0, 8], sizes = [8, 8], strides = [1, 1]} : vector<8x32xbf16> to vector<8x8xbf16>
    %30 = vector.extract_strided_slice %5 {offsets = [0, 8], sizes = [8, 8], strides = [1, 1]} : vector<8x32xbf16> to vector<8x8xbf16>
    %cst_16 = arith.constant dense<0.000000e+00> : vector<8x8xf32>
    %31 = tpu.matmul %28, %29, %cst_16 {dimension_numbers = #tpu.dot_dimension_numbers<[1], [1], [0], [0], [0, 0, 1, 0], [], []>} : vector<8x8xbf16>, vector<8x8xbf16>, vector<8x8xf32> -> vector<8x8xf32>
    %32 = arith.addf %31, %6 : vector<8x8xf32>
    %cst_17 = arith.constant dense<0xFF800000> : vector<8xf32>
    %33 = vector.multi_reduction <maximumf>, %32, %cst_17 [1] : vector<8x8xf32> to vector<8xf32>
    %34 = vector.shape_cast %33 : vector<8xf32> to vector<8x1xf32>
    %35 = vector.broadcast %34 : vector<8x1xf32> to vector<8x8xf32>
    %36 = arith.subf %32, %35 : vector<8x8xf32>
    %37 = math.exp %36 : vector<8x8xf32>
    %cst_18 = arith.constant dense<0.000000e+00> : vector<8xf32>
    %38 = vector.multi_reduction <add>, %37, %cst_18 [1] : vector<8x8xf32> to vector<8xf32>
    %39 = vector.shape_cast %38 : vector<8xf32> to vector<8x1xf32>
    %40 = tpu.reciprocal %39 {approx = true} : vector<8x1xf32> -> vector<8x1xf32>
    %41 = vector.broadcast %40 : vector<8x1xf32> to vector<8x8xf32>
    %42 = arith.mulf %37, %41 : vector<8x8xf32>
    %43 = arith.truncf %42 : vector<8x8xf32> to vector<8x8xbf16>
    %cst_19 = arith.constant dense<0.000000e+00> : vector<8x8xf32>
    %44 = tpu.matmul %43, %30, %cst_19 {dimension_numbers = #tpu.dot_dimension_numbers<[1], [0], [0], [1], [0, 0, 1, 1], [], []>} : vector<8x8xbf16>, vector<8x8xbf16>, vector<8x8xf32> -> vector<8x8xf32>
    %45 = arith.truncf %44 : vector<8x8xf32> to vector<8x8xbf16>
    %c0_20 = arith.constant 0 : index
    %c0_21 = arith.constant 0 : index
    %c8 = arith.constant 8 : index
    %46 = vector.load %arg5[%c0_20, %c0_21, %c8] : memref<1x8x32xbf16, #tpu.memory_space<vmem>>, vector<1x8x8xbf16>
    %47 = vector.shape_cast %46 : vector<1x8x8xbf16> to vector<8x8xbf16>
    %48 = vector.shape_cast %45 : vector<8x8xbf16> to vector<1x8x8xbf16>
    tpu.vector_store %arg5[%c0_20, %c0_21, %c8], %48 {strides = array<i32>} : memref<1x8x32xbf16, #tpu.memory_space<vmem>>, vector<1x8x8xbf16>,
    %49 = vector.extract_strided_slice %1 {offsets = [0, 16], sizes = [8, 8], strides = [1, 1]} : vector<8x32xbf16> to vector<8x8xbf16>
    %50 = vector.extract_strided_slice %3 {offsets = [0, 16], sizes = [8, 8], strides = [1, 1]} : vector<8x32xbf16> to vector<8x8xbf16>
    %51 = vector.extract_strided_slice %5 {offsets = [0, 16], sizes = [8, 8], strides = [1, 1]} : vector<8x32xbf16> to vector<8x8xbf16>
    %cst_22 = arith.constant dense<0.000000e+00> : vector<8x8xf32>
    %52 = tpu.matmul %49, %50, %cst_22 {dimension_numbers = #tpu.dot_dimension_numbers<[1], [1], [0], [0], [0, 0, 1, 0], [], []>} : vector<8x8xbf16>, vector<8x8xbf16>, vector<8x8xf32> -> vector<8x8xf32>
    %53 = arith.addf %52, %6 : vector<8x8xf32>
    %cst_23 = arith.constant dense<0xFF800000> : vector<8xf32>
    %54 = vector.multi_reduction <maximumf>, %53, %cst_23 [1] : vector<8x8xf32> to vector<8xf32>
    %55 = vector.shape_cast %54 : vector<8xf32> to vector<8x1xf32>
    %56 = vector.broadcast %55 : vector<8x1xf32> to vector<8x8xf32>
    %57 = arith.subf %53, %56 : vector<8x8xf32>
    %58 = math.exp %57 : vector<8x8xf32>
    %cst_24 = arith.constant dense<0.000000e+00> : vector<8xf32>
    %59 = vector.multi_reduction <add>, %58, %cst_24 [1] : vector<8x8xf32> to vector<8xf32>
    %60 = vector.shape_cast %59 : vector<8xf32> to vector<8x1xf32>
    %61 = tpu.reciprocal %60 {approx = true} : vector<8x1xf32> -> vector<8x1xf32>
    %62 = vector.broadcast %61 : vector<8x1xf32> to vector<8x8xf32>
    %63 = arith.mulf %58, %62 : vector<8x8xf32>
    %64 = arith.truncf %63 : vector<8x8xf32> to vector<8x8xbf16>
    %cst_25 = arith.constant dense<0.000000e+00> : vector<8x8xf32>
    %65 = tpu.matmul %64, %51, %cst_25 {dimension_numbers = #tpu.dot_dimension_numbers<[1], [0], [0], [1], [0, 0, 1, 1], [], []>} : vector<8x8xbf16>, vector<8x8xbf16>, vector<8x8xf32> -> vector<8x8xf32>
    %66 = arith.truncf %65 : vector<8x8xf32> to vector<8x8xbf16>
    %c0_26 = arith.constant 0 : index
    %c0_27 = arith.constant 0 : index
    %c16 = arith.constant 16 : index
    %67 = vector.load %arg5[%c0_26, %c0_27, %c16] : memref<1x8x32xbf16, #tpu.memory_space<vmem>>, vector<1x8x8xbf16>
    %68 = vector.shape_cast %67 : vector<1x8x8xbf16> to vector<8x8xbf16>
    %69 = vector.shape_cast %66 : vector<8x8xbf16> to vector<1x8x8xbf16>
    tpu.vector_store %arg5[%c0_26, %c0_27, %c16], %69 {strides = array<i32>} : memref<1x8x32xbf16, #tpu.memory_space<vmem>>, vector<1x8x8xbf16>,
    %70 = vector.extract_strided_slice %1 {offsets = [0, 24], sizes = [8, 8], strides = [1, 1]} : vector<8x32xbf16> to vector<8x8xbf16>
    %71 = vector.extract_strided_slice %3 {offsets = [0, 24], sizes = [8, 8], strides = [1, 1]} : vector<8x32xbf16> to vector<8x8xbf16>
    %72 = vector.extract_strided_slice %5 {offsets = [0, 24], sizes = [8, 8], strides = [1, 1]} : vector<8x32xbf16> to vector<8x8xbf16>
    %cst_28 = arith.constant dense<0.000000e+00> : vector<8x8xf32>
    %73 = tpu.matmul %70, %71, %cst_28 {dimension_numbers = #tpu.dot_dimension_numbers<[1], [1], [0], [0], [0, 0, 1, 0], [], []>} : vector<8x8xbf16>, vector<8x8xbf16>, vector<8x8xf32> -> vector<8x8xf32>
    %74 = arith.addf %73, %6 : vector<8x8xf32>
    %cst_29 = arith.constant dense<0xFF800000> : vector<8xf32>
    %75 = vector.multi_reduction <maximumf>, %74, %cst_29 [1] : vector<8x8xf32> to vector<8xf32>
    %76 = vector.shape_cast %75 : vector<8xf32> to vector<8x1xf32>
    %77 = vector.broadcast %76 : vector<8x1xf32> to vector<8x8xf32>
    %78 = arith.subf %74, %77 : vector<8x8xf32>
    %79 = math.exp %78 : vector<8x8xf32>
    %cst_30 = arith.constant dense<0.000000e+00> : vector<8xf32>
    %80 = vector.multi_reduction <add>, %79, %cst_30 [1] : vector<8x8xf32> to vector<8xf32>
    %81 = vector.shape_cast %80 : vector<8xf32> to vector<8x1xf32>
    %82 = tpu.reciprocal %81 {approx = true} : vector<8x1xf32> -> vector<8x1xf32>
    %83 = vector.broadcast %82 : vector<8x1xf32> to vector<8x8xf32>
    %84 = arith.mulf %79, %83 : vector<8x8xf32>
    %85 = arith.truncf %84 : vector<8x8xf32> to vector<8x8xbf16>
    %cst_31 = arith.constant dense<0.000000e+00> : vector<8x8xf32>
    %86 = tpu.matmul %85, %72, %cst_31 {dimension_numbers = #tpu.dot_dimension_numbers<[1], [0], [0], [1], [0, 0, 1, 1], [], []>} : vector<8x8xbf16>, vector<8x8xbf16>, vector<8x8xf32> -> vector<8x8xf32>
    %87 = arith.truncf %86 : vector<8x8xf32> to vector<8x8xbf16>
    %c0_32 = arith.constant 0 : index
    %c0_33 = arith.constant 0 : index
    %c24 = arith.constant 24 : index
    %88 = vector.load %arg5[%c0_32, %c0_33, %c24] : memref<1x8x32xbf16, #tpu.memory_space<vmem>>, vector<1x8x8xbf16>
    %89 = vector.shape_cast %88 : vector<1x8x8xbf16> to vector<8x8xbf16>
    %90 = vector.shape_cast %87 : vector<8x8xbf16> to vector<1x8x8xbf16>
    tpu.vector_store %arg5[%c0_32, %c0_33, %c24], %90 {strides = array<i32>} : memref<1x8x32xbf16, #tpu.memory_space<vmem>>, vector<1x8x8xbf16>,
    return
  }
  func.func @transform_0(%arg0: i32) -> (i32, i32, i32) {
    %c0_i32 = arith.constant 0 : i32
    %c0_i32_0 = arith.constant 0 : i32
    %c0_i32_1 = arith.constant 0 : i32
    return %arg0, %c0_i32, %c0_i32_0 : i32, i32, i32
  }
  func.func @transform_1(%arg0: i32) -> (i32, i32, i32) {
    %c0_i32 = arith.constant 0 : i32
    %c0_i32_0 = arith.constant 0 : i32
    %c0_i32_1 = arith.constant 0 : i32
    return %arg0, %c0_i32, %c0_i32_0 : i32, i32, i32
  }
  func.func @transform_2(%arg0: i32) -> (i32, i32, i32) {
    %c0_i32 = arith.constant 0 : i32
    %c0_i32_0 = arith.constant 0 : i32
    %c0_i32_1 = arith.constant 0 : i32
    return %arg0, %c0_i32, %c0_i32_0 : i32, i32, i32
  }
  func.func @transform_3(%arg0: i32) -> (i32, i32) {
    %c0_i32 = arith.constant 0 : i32
    %c0_i32_0 = arith.constant 0 : i32
    %c0_i32_1 = arith.constant 0 : i32
    return %c0_i32, %c0_i32_0 : i32, i32
  }
  func.func @transform_4(%arg0: i32) -> (i32, i32, i32) {
    %c0_i32 = arith.constant 0 : i32
    %c0_i32_0 = arith.constant 0 : i32
    %c0_i32_1 = arith.constant 0 : i32
    return %arg0, %c0_i32, %c0_i32_0 : i32, i32, i32
  }
}

module attributes {stable_mosaic.version = 11 : i64} {
  func.func @_layernorm_res_kernel(%arg0: i32, %arg1: memref<16x32xbf16, #tpu.memory_space<vmem>>, %arg2: memref<16x32xbf16, #tpu.memory_space<vmem>>, %arg3: memref<1x32xf32, #tpu.memory_space<vmem>>, %arg4: memref<1x32xf32, #tpu.memory_space<vmem>>, %arg5: memref<16x32xbf16, #tpu.memory_space<vmem>>) attributes {dimension_semantics = [#tpu.dimension_semantics<parallel>], iteration_bounds = array<i64: 1>, scalar_prefetch = 0 : i64, scratch_operands = 0 : i64, tpu.core_type = #tpu.core_type<tc>, window_params = [{transform_indices = @transform_0, window_bounds = array<i64: 16, 32>}, {transform_indices = @transform_1, window_bounds = array<i64: 16, 32>}, {pipeline_mode = #tpu.pipeline_mode<synchronous>, transform_indices = @transform_2, window_bounds = array<i64: 1, 32>}, {pipeline_mode = #tpu.pipeline_mode<synchronous>, transform_indices = @transform_3, window_bounds = array<i64: 1, 32>}, {transform_indices = @transform_4, window_bounds = array<i64: 16, 32>}]} {
    %c0 = arith.constant 0 : index
    %c0_0 = arith.constant 0 : index
    %0 = vector.load %arg1[%c0, %c0_0] : memref<16x32xbf16, #tpu.memory_space<vmem>>, vector<16x32xbf16>
    %1 = arith.extf %0 : vector<16x32xbf16> to vector<16x32xf32>
    %c0_1 = arith.constant 0 : index
    %c0_2 = arith.constant 0 : index
    %2 = vector.load %arg2[%c0_1, %c0_2] : memref<16x32xbf16, #tpu.memory_space<vmem>>, vector<16x32xbf16>
    %3 = arith.extf %2 : vector<16x32xbf16> to vector<16x32xf32>
    %4 = arith.addf %1, %3 : vector<16x32xf32>
    %cst = arith.constant dense<0.000000e+00> : vector<16xf32>
    %5 = vector.multi_reduction <add>, %4, %cst [1] : vector<16x32xf32> to vector<16xf32>
    %6 = vector.shape_cast %5 : vector<16xf32> to vector<16x1xf32>
    %cst_3 = arith.constant 3.200000e+01 : f32
    %7 = vector.broadcast %cst_3 : f32 to vector<16x1xf32>
    %8 = arith.divf %6, %7 : vector<16x1xf32>
    %9 = vector.broadcast %8 : vector<16x1xf32> to vector<16x32xf32>
    %10 = arith.subf %4, %9 : vector<16x32xf32>
    %11 = arith.mulf %10, %10 : vector<16x32xf32>
    %cst_4 = arith.constant dense<0.000000e+00> : vector<16xf32>
    %12 = vector.multi_reduction <add>, %11, %cst_4 [1] : vector<16x32xf32> to vector<16xf32>
    %13 = vector.shape_cast %12 : vector<16xf32> to vector<16x1xf32>
    %cst_5 = arith.constant 3.200000e+01 : f32
    %14 = vector.broadcast %cst_5 : f32 to vector<16x1xf32>
    %15 = arith.divf %13, %14 : vector<16x1xf32>
    %16 = vector.broadcast %8 : vector<16x1xf32> to vector<16x32xf32>
    %17 = arith.subf %4, %16 : vector<16x32xf32>
    %cst_6 = arith.constant 9.99999974E-6 : f32
    %18 = vector.broadcast %cst_6 : f32 to vector<16x1xf32>
    %19 = arith.addf %15, %18 : vector<16x1xf32>
    %20 = math.rsqrt %19 : vector<16x1xf32>
    %21 = vector.broadcast %20 : vector<16x1xf32> to vector<16x32xf32>
    %22 = arith.mulf %17, %21 : vector<16x32xf32>
    %c0_7 = arith.constant 0 : index
    %c0_8 = arith.constant 0 : index
    %23 = vector.load %arg3[%c0_7, %c0_8] : memref<1x32xf32, #tpu.memory_space<vmem>>, vector<1x32xf32>
    %24 = vector.broadcast %23 : vector<1x32xf32> to vector<16x32xf32>
    %25 = arith.mulf %22, %24 : vector<16x32xf32>
    %c0_9 = arith.constant 0 : index
    %c0_10 = arith.constant 0 : index
    %26 = vector.load %arg4[%c0_9, %c0_10] : memref<1x32xf32, #tpu.memory_space<vmem>>, vector<1x32xf32>
    %27 = vector.broadcast %26 : vector<1x32xf32> to vector<16x32xf32>
    %28 = arith.addf %25, %27 : vector<16x32xf32>
    %29 = arith.truncf %28 : vector<16x32xf32> to vector<16x32xbf16>
    %c0_11 = arith.constant 0 : index
    %c0_12 = arith.constant 0 : index
    %30 = vector.load %arg5[%c0_11, %c0_12] : memref<16x32xbf16, #tpu.memory_space<vmem>>, vector<16x32xbf16>
    tpu.vector_store %arg5[%c0_11, %c0_12], %29 {strides = array<i32>} : memref<16x32xbf16, #tpu.memory_space<vmem>>, vector<16x32xbf16>,
    return
  }
  func.func @transform_0(%arg0: i32) -> (i32, i32) {
    %c0_i32 = arith.constant 0 : i32
    %c0_i32_0 = arith.constant 0 : i32
    return %arg0, %c0_i32 : i32, i32
  }
  func.func @transform_1(%arg0: i32) -> (i32, i32) {
    %c0_i32 = arith.constant 0 : i32
    %c0_i32_0 = arith.constant 0 : i32
    return %arg0, %c0_i32 : i32, i32
  }
  func.func @transform_2(%arg0: i32) -> (i32, i32) {
    %c0_i32 = arith.constant 0 : i32
    %c0_i32_0 = arith.constant 0 : i32
    %c0_i32_1 = arith.constant 0 : i32
    return %c0_i32, %c0_i32_0 : i32, i32
  }
  func.func @transform_3(%arg0: i32) -> (i32, i32) {
    %c0_i32 = arith.constant 0 : i32
    %c0_i32_0 = arith.constant 0 : i32
    %c0_i32_1 = arith.constant 0 : i32
    return %c0_i32, %c0_i32_0 : i32, i32
  }
  func.func @transform_4(%arg0: i32) -> (i32, i32) {
    %c0_i32 = arith.constant 0 : i32
    %c0_i32_0 = arith.constant 0 : i32
    return %arg0, %c0_i32 : i32, i32
  }
}

module attributes {stable_mosaic.version = 11 : i64} {
  func.func @_ffn_kernel(%arg0: i32, %arg1: memref<16x128xbf16, #tpu.memory_space<vmem>>, %arg2: memref<128x128xbf16, #tpu.memory_space<vmem>>, %arg3: memref<1x128xf32, #tpu.memory_space<vmem>>, %arg4: memref<128x128xbf16, #tpu.memory_space<vmem>>, %arg5: memref<1x128xf32, #tpu.memory_space<vmem>>, %arg6: memref<16x128xbf16, #tpu.memory_space<vmem>>) attributes {dimension_semantics = [#tpu.dimension_semantics<parallel>], iteration_bounds = array<i64: 1>, scalar_prefetch = 0 : i64, scratch_operands = 0 : i64, tpu.core_type = #tpu.core_type<tc>, window_params = [{transform_indices = @transform_0, window_bounds = array<i64: 16, 128>}, {pipeline_mode = #tpu.pipeline_mode<synchronous>, transform_indices = @transform_1, window_bounds = array<i64: 128, 128>}, {pipeline_mode = #tpu.pipeline_mode<synchronous>, transform_indices = @transform_2, window_bounds = array<i64: 1, 128>}, {pipeline_mode = #tpu.pipeline_mode<synchronous>, transform_indices = @transform_3, window_bounds = array<i64: 128, 128>}, {pipeline_mode = #tpu.pipeline_mode<synchronous>, transform_indices = @transform_4, window_bounds = array<i64: 1, 128>}, {transform_indices = @transform_5, window_bounds = array<i64: 16, 128>}]} {
    %c0 = arith.constant 0 : index
    %c0_0 = arith.constant 0 : index
    %0 = vector.load %arg1[%c0, %c0_0] : memref<16x128xbf16, #tpu.memory_space<vmem>>, vector<16x128xbf16>
    %c0_1 = arith.constant 0 : index
    %c0_2 = arith.constant 0 : index
    %1 = vector.load %arg2[%c0_1, %c0_2] : memref<128x128xbf16, #tpu.memory_space<vmem>>, vector<128x128xbf16>
    %cst = arith.constant dense<0.000000e+00> : vector<16x128xf32>
    %2 = tpu.matmul %0, %1, %cst {dimension_numbers = #tpu.dot_dimension_numbers<[1], [0], [0], [1], [0, 0, 1, 1], [], []>} : vector<16x128xbf16>, vector<128x128xbf16>, vector<16x128xf32> -> vector<16x128xf32>
    %c0_3 = arith.constant 0 : index
    %c0_4 = arith.constant 0 : index
    %3 = vector.load %arg3[%c0_3, %c0_4] : memref<1x128xf32, #tpu.memory_space<vmem>>, vector<1x128xf32>
    %4 = vector.broadcast %3 : vector<1x128xf32> to vector<16x128xf32>
    %5 = arith.addf %2, %4 : vector<16x128xf32>
    %cst_5 = arith.constant 0.000000e+00 : f32
    %6 = vector.broadcast %cst_5 : f32 to vector<16x128xf32>
    %7 = arith.maximumf %5, %6 : vector<16x128xf32>
    %8 = arith.truncf %7 : vector<16x128xf32> to vector<16x128xbf16>
    %c0_6 = arith.constant 0 : index
    %c0_7 = arith.constant 0 : index
    %9 = vector.load %arg4[%c0_6, %c0_7] : memref<128x128xbf16, #tpu.memory_space<vmem>>, vector<128x128xbf16>
    %cst_8 = arith.constant dense<0.000000e+00> : vector<16x128xf32>
    %10 = tpu.matmul %8, %9, %cst_8 {dimension_numbers = #tpu.dot_dimension_numbers<[1], [0], [0], [1], [0, 0, 1, 1], [], []>} : vector<16x128xbf16>, vector<128x128xbf16>, vector<16x128xf32> -> vector<16x128xf32>
    %c0_9 = arith.constant 0 : index
    %c0_10 = arith.constant 0 : index
    %11 = vector.load %arg5[%c0_9, %c0_10] : memref<1x128xf32, #tpu.memory_space<vmem>>, vector<1x128xf32>
    %12 = vector.broadcast %11 : vector<1x128xf32> to vector<16x128xf32>
    %13 = arith.addf %10, %12 : vector<16x128xf32>
    %14 = arith.truncf %13 : vector<16x128xf32> to vector<16x128xbf16>
    %c0_11 = arith.constant 0 : index
    %c0_12 = arith.constant 0 : index
    %15 = vector.load %arg6[%c0_11, %c0_12] : memref<16x128xbf16, #tpu.memory_space<vmem>>, vector<16x128xbf16>
    tpu.vector_store %arg6[%c0_11, %c0_12], %14 {strides = array<i32>} : memref<16x128xbf16, #tpu.memory_space<vmem>>, vector<16x128xbf16>,
    return
  }
  func.func @transform_0(%arg0: i32) -> (i32, i32) {
    %c0_i32 = arith.constant 0 : i32
    %c0_i32_0 = arith.constant 0 : i32
    return %arg0, %c0_i32 : i32, i32
  }
  func.func @transform_1(%arg0: i32) -> (i32, i32) {
    %c0_i32 = arith.constant 0 : i32
    %c0_i32_0 = arith.constant 0 : i32
    %c0_i32_1 = arith.constant 0 : i32
    return %c0_i32, %c0_i32_0 : i32, i32
  }
  func.func @transform_2(%arg0: i32) -> (i32, i32) {
    %c0_i32 = arith.constant 0 : i32
    %c0_i32_0 = arith.constant 0 : i32
    %c0_i32_1 = arith.constant 0 : i32
    return %c0_i32, %c0_i32_0 : i32, i32
  }
  func.func @transform_3(%arg0: i32) -> (i32, i32) {
    %c0_i32 = arith.constant 0 : i32
    %c0_i32_0 = arith.constant 0 : i32
    %c0_i32_1 = arith.constant 0 : i32
    return %c0_i32, %c0_i32_0 : i32, i32
  }
  func.func @transform_4(%arg0: i32) -> (i32, i32) {
    %c0_i32 = arith.constant 0 : i32
    %c0_i32_0 = arith.constant 0 : i32
    %c0_i32_1 = arith.constant 0 : i32
    return %c0_i32, %c0_i32_0 : i32, i32
  }
  func.func @transform_5(%arg0: i32) -> (i32, i32) {
    %c0_i32 = arith.constant 0 : i32
    %c0_i32_0 = arith.constant 0 : i32
    return %arg0, %c0_i32 : i32, i32
  }
}

module attributes {stable_mosaic.version = 11 : i64} {
  func.func @_ffn_kernel(%arg0: i32, %arg1: memref<16x128xbf16, #tpu.memory_space<vmem>>, %arg2: memref<128x128xbf16, #tpu.memory_space<vmem>>, %arg3: memref<1x128xf32, #tpu.memory_space<vmem>>, %arg4: memref<128x128xbf16, #tpu.memory_space<vmem>>, %arg5: memref<1x128xf32, #tpu.memory_space<vmem>>, %arg6: memref<16x128xbf16, #tpu.memory_space<vmem>>) attributes {dimension_semantics = [#tpu.dimension_semantics<parallel>], iteration_bounds = array<i64: 1>, scalar_prefetch = 0 : i64, scratch_operands = 0 : i64, tpu.core_type = #tpu.core_type<tc>, window_params = [{transform_indices = @transform_0, window_bounds = array<i64: 16, 128>}, {pipeline_mode = #tpu.pipeline_mode<synchronous>, transform_indices = @transform_1, window_bounds = array<i64: 128, 128>}, {pipeline_mode = #tpu.pipeline_mode<synchronous>, transform_indices = @transform_2, window_bounds = array<i64: 1, 128>}, {pipeline_mode = #tpu.pipeline_mode<synchronous>, transform_indices = @transform_3, window_bounds = array<i64: 128, 128>}, {pipeline_mode = #tpu.pipeline_mode<synchronous>, transform_indices = @transform_4, window_bounds = array<i64: 1, 128>}, {transform_indices = @transform_5, window_bounds = array<i64: 16, 128>}]} {
    %c0 = arith.constant 0 : index
    %c0_0 = arith.constant 0 : index
    %0 = vector.load %arg1[%c0, %c0_0] : memref<16x128xbf16, #tpu.memory_space<vmem>>, vector<16x128xbf16>
    %c0_1 = arith.constant 0 : index
    %c0_2 = arith.constant 0 : index
    %1 = vector.load %arg2[%c0_1, %c0_2] : memref<128x128xbf16, #tpu.memory_space<vmem>>, vector<128x128xbf16>
    %cst = arith.constant dense<0.000000e+00> : vector<16x128xf32>
    %2 = tpu.matmul %0, %1, %cst {dimension_numbers = #tpu.dot_dimension_numbers<[1], [0], [0], [1], [0, 0, 1, 1], [], []>} : vector<16x128xbf16>, vector<128x128xbf16>, vector<16x128xf32> -> vector<16x128xf32>
    %c0_3 = arith.constant 0 : index
    %c0_4 = arith.constant 0 : index
    %3 = vector.load %arg3[%c0_3, %c0_4] : memref<1x128xf32, #tpu.memory_space<vmem>>, vector<1x128xf32>
    %4 = vector.broadcast %3 : vector<1x128xf32> to vector<16x128xf32>
    %5 = arith.addf %2, %4 : vector<16x128xf32>
    %cst_5 = arith.constant 0.000000e+00 : f32
    %6 = vector.broadcast %cst_5 : f32 to vector<16x128xf32>
    %7 = arith.maximumf %5, %6 : vector<16x128xf32>
    %8 = arith.truncf %7 : vector<16x128xf32> to vector<16x128xbf16>
    %c0_6 = arith.constant 0 : index
    %c0_7 = arith.constant 0 : index
    %9 = vector.load %arg4[%c0_6, %c0_7] : memref<128x128xbf16, #tpu.memory_space<vmem>>, vector<128x128xbf16>
    %cst_8 = arith.constant dense<0.000000e+00> : vector<16x128xf32>
    %10 = tpu.matmul %8, %9, %cst_8 {dimension_numbers = #tpu.dot_dimension_numbers<[1], [0], [0], [1], [0, 0, 1, 1], [], []>} : vector<16x128xbf16>, vector<128x128xbf16>, vector<16x128xf32> -> vector<16x128xf32>
    %c0_9 = arith.constant 0 : index
    %c0_10 = arith.constant 0 : index
    %11 = vector.load %arg5[%c0_9, %c0_10] : memref<1x128xf32, #tpu.memory_space<vmem>>, vector<1x128xf32>
    %12 = vector.broadcast %11 : vector<1x128xf32> to vector<16x128xf32>
    %13 = arith.addf %10, %12 : vector<16x128xf32>
    %14 = arith.truncf %13 : vector<16x128xf32> to vector<16x128xbf16>
    %c0_11 = arith.constant 0 : index
    %c0_12 = arith.constant 0 : index
    %15 = vector.load %arg6[%c0_11, %c0_12] : memref<16x128xbf16, #tpu.memory_space<vmem>>, vector<16x128xbf16>
    tpu.vector_store %arg6[%c0_11, %c0_12], %14 {strides = array<i32>} : memref<16x128xbf16, #tpu.memory_space<vmem>>, vector<16x128xbf16>,
    return
  }
  func.func @transform_0(%arg0: i32) -> (i32, i32) {
    %c0_i32 = arith.constant 0 : i32
    %c0_i32_0 = arith.constant 0 : i32
    return %arg0, %c0_i32 : i32, i32
  }
  func.func @transform_1(%arg0: i32) -> (i32, i32) {
    %c0_i32 = arith.constant 0 : i32
    %c0_i32_0 = arith.constant 0 : i32
    %c0_i32_1 = arith.constant 0 : i32
    return %c0_i32, %c0_i32_0 : i32, i32
  }
  func.func @transform_2(%arg0: i32) -> (i32, i32) {
    %c0_i32 = arith.constant 0 : i32
    %c0_i32_0 = arith.constant 0 : i32
    %c0_i32_1 = arith.constant 0 : i32
    return %c0_i32, %c0_i32_0 : i32, i32
  }
  func.func @transform_3(%arg0: i32) -> (i32, i32) {
    %c0_i32 = arith.constant 0 : i32
    %c0_i32_0 = arith.constant 0 : i32
    %c0_i32_1 = arith.constant 0 : i32
    return %c0_i32, %c0_i32_0 : i32, i32
  }
  func.func @transform_4(%arg0: i32) -> (i32, i32) {
    %c0_i32 = arith.constant 0 : i32
    %c0_i32_0 = arith.constant 0 : i32
    %c0_i32_1 = arith.constant 0 : i32
    return %c0_i32, %c0_i32_0 : i32, i32
  }
  func.func @transform_5(%arg0: i32) -> (i32, i32) {
    %c0_i32 = arith.constant 0 : i32
    %c0_i32_0 = arith.constant 0 : i32
    return %arg0, %c0_i32 : i32, i32
  }
}

module attributes {stable_mosaic.version = 11 : i64} {
  func.func @_attention_kernel(%arg0: i32, %arg1: memref<1x8x32xbf16, #tpu.memory_space<vmem>>, %arg2: memref<1x8x32xbf16, #tpu.memory_space<vmem>>, %arg3: memref<1x8x32xbf16, #tpu.memory_space<vmem>>, %arg4: memref<8x8xf32, #tpu.memory_space<vmem>>, %arg5: memref<1x8x32xbf16, #tpu.memory_space<vmem>>, %arg6: memref<1x4x8x8xf32, #tpu.memory_space<vmem>>) attributes {dimension_semantics = [#tpu.dimension_semantics<parallel>], iteration_bounds = array<i64: 2>, scalar_prefetch = 0 : i64, scratch_operands = 0 : i64, tpu.core_type = #tpu.core_type<tc>, window_params = [{transform_indices = @transform_0, window_bounds = array<i64: 1, 8, 32>}, {transform_indices = @transform_1, window_bounds = array<i64: 1, 8, 32>}, {transform_indices = @transform_2, window_bounds = array<i64: 1, 8, 32>}, {pipeline_mode = #tpu.pipeline_mode<synchronous>, transform_indices = @transform_3, window_bounds = array<i64: 8, 8>}, {transform_indices = @transform_4, window_bounds = array<i64: 1, 8, 32>}, {transform_indices = @transform_5, window_bounds = array<i64: 1, 4, 8, 8>}]} {
    %c0 = arith.constant 0 : index
    %c0_0 = arith.constant 0 : index
    %c0_1 = arith.constant 0 : index
    %0 = vector.load %arg1[%c0, %c0_0, %c0_1] : memref<1x8x32xbf16, #tpu.memory_space<vmem>>, vector<1x8x32xbf16>
    %1 = vector.shape_cast %0 : vector<1x8x32xbf16> to vector<8x32xbf16>
    %c0_2 = arith.constant 0 : index
    %c0_3 = arith.constant 0 : index
    %c0_4 = arith.constant 0 : index
    %2 = vector.load %arg2[%c0_2, %c0_3, %c0_4] : memref<1x8x32xbf16, #tpu.memory_space<vmem>>, vector<1x8x32xbf16>
    %3 = vector.shape_cast %2 : vector<1x8x32xbf16> to vector<8x32xbf16>
    %c0_5 = arith.constant 0 : index
    %c0_6 = arith.constant 0 : index
    %c0_7 = arith.constant 0 : index
    %4 = vector.load %arg3[%c0_5, %c0_6, %c0_7] : memref<1x8x32xbf16, #tpu.memory_space<vmem>>, vector<1x8x32xbf16>
    %5 = vector.shape_cast %4 : vector<1x8x32xbf16> to vector<8x32xbf16>
    %c0_8 = arith.constant 0 : index
    %c0_9 = arith.constant 0 : index
    %6 = vector.load %arg4[%c0_8, %c0_9] : memref<8x8xf32, #tpu.memory_space<vmem>>, vector<8x8xf32>
    %7 = vector.extract_strided_slice %1 {offsets = [0, 0], sizes = [8, 8], strides = [1, 1]} : vector<8x32xbf16> to vector<8x8xbf16>
    %8 = vector.extract_strided_slice %3 {offsets = [0, 0], sizes = [8, 8], strides = [1, 1]} : vector<8x32xbf16> to vector<8x8xbf16>
    %9 = vector.extract_strided_slice %5 {offsets = [0, 0], sizes = [8, 8], strides = [1, 1]} : vector<8x32xbf16> to vector<8x8xbf16>
    %cst = arith.constant dense<0.000000e+00> : vector<8x8xf32>
    %10 = tpu.matmul %7, %8, %cst {dimension_numbers = #tpu.dot_dimension_numbers<[1], [1], [0], [0], [0, 0, 1, 0], [], []>} : vector<8x8xbf16>, vector<8x8xbf16>, vector<8x8xf32> -> vector<8x8xf32>
    %11 = arith.addf %10, %6 : vector<8x8xf32>
    %cst_10 = arith.constant dense<0xFF800000> : vector<8xf32>
    %12 = vector.multi_reduction <maximumf>, %11, %cst_10 [1] : vector<8x8xf32> to vector<8xf32>
    %13 = vector.shape_cast %12 : vector<8xf32> to vector<8x1xf32>
    %14 = vector.broadcast %13 : vector<8x1xf32> to vector<8x8xf32>
    %15 = arith.subf %11, %14 : vector<8x8xf32>
    %16 = math.exp %15 : vector<8x8xf32>
    %cst_11 = arith.constant dense<0.000000e+00> : vector<8xf32>
    %17 = vector.multi_reduction <add>, %16, %cst_11 [1] : vector<8x8xf32> to vector<8xf32>
    %18 = vector.shape_cast %17 : vector<8xf32> to vector<8x1xf32>
    %19 = vector.broadcast %18 : vector<8x1xf32> to vector<8x8xf32>
    %20 = arith.divf %16, %19 : vector<8x8xf32>
    %c0_12 = arith.constant 0 : index
    %c0_13 = arith.constant 0 : index
    %c0_14 = arith.constant 0 : index
    %c0_15 = arith.constant 0 : index
    %21 = vector.load %arg6[%c0_12, %c0_13, %c0_14, %c0_15] : memref<1x4x8x8xf32, #tpu.memory_space<vmem>>, vector<1x1x8x8xf32>
    %22 = vector.shape_cast %21 : vector<1x1x8x8xf32> to vector<8x8xf32>
    %23 = vector.shape_cast %20 : vector<8x8xf32> to vector<1x1x8x8xf32>
    tpu.vector_store %arg6[%c0_12, %c0_13, %c0_14, %c0_15], %23 {strides = array<i32>} : memref<1x4x8x8xf32, #tpu.memory_space<vmem>>, vector<1x1x8x8xf32>,
    %24 = arith.truncf %20 : vector<8x8xf32> to vector<8x8xbf16>
    %cst_16 = arith.constant dense<0.000000e+00> : vector<8x8xf32>
    %25 = tpu.matmul %24, %9, %cst_16 {dimension_numbers = #tpu.dot_dimension_numbers<[1], [0], [0], [1], [0, 0, 1, 1], [], []>} : vector<8x8xbf16>, vector<8x8xbf16>, vector<8x8xf32> -> vector<8x8xf32>
    %26 = arith.truncf %25 : vector<8x8xf32> to vector<8x8xbf16>
    %c0_17 = arith.constant 0 : index
    %c0_18 = arith.constant 0 : index
    %c0_19 = arith.constant 0 : index
    %27 = vector.load %arg5[%c0_17, %c0_18, %c0_19] : memref<1x8x32xbf16, #tpu.memory_space<vmem>>, vector<1x8x8xbf16>
    %28 = vector.shape_cast %27 : vector<1x8x8xbf16> to vector<8x8xbf16>
    %29 = vector.shape_cast %26 : vector<8x8xbf16> to vector<1x8x8xbf16>
    tpu.vector_store %arg5[%c0_17, %c0_18, %c0_19], %29 {strides = array<i32>} : memref<1x8x32xbf16, #tpu.memory_space<vmem>>, vector<1x8x8xbf16>,
    %30 = vector.extract_strided_slice %1 {offsets = [0, 8], sizes = [8, 8], strides = [1, 1]} : vector<8x32xbf16> to vector<8x8xbf16>
    %31 = vector.extract_strided_slice %3 {offsets = [0, 8], sizes = [8, 8], strides = [1, 1]} : vector<8x32xbf16> to vector<8x8xbf16>
    %32 = vector.extract_strided_slice %5 {offsets = [0, 8], sizes = [8, 8], strides = [1, 1]} : vector<8x32xbf16> to vector<8x8xbf16>
    %cst_20 = arith.constant dense<0.000000e+00> : vector<8x8xf32>
    %33 = tpu.matmul %30, %31, %cst_20 {dimension_numbers = #tpu.dot_dimension_numbers<[1], [1], [0], [0], [0, 0, 1, 0], [], []>} : vector<8x8xbf16>, vector<8x8xbf16>, vector<8x8xf32> -> vector<8x8xf32>
    %34 = arith.addf %33, %6 : vector<8x8xf32>
    %cst_21 = arith.constant dense<0xFF800000> : vector<8xf32>
    %35 = vector.multi_reduction <maximumf>, %34, %cst_21 [1] : vector<8x8xf32> to vector<8xf32>
    %36 = vector.shape_cast %35 : vector<8xf32> to vector<8x1xf32>
    %37 = vector.broadcast %36 : vector<8x1xf32> to vector<8x8xf32>
    %38 = arith.subf %34, %37 : vector<8x8xf32>
    %39 = math.exp %38 : vector<8x8xf32>
    %cst_22 = arith.constant dense<0.000000e+00> : vector<8xf32>
    %40 = vector.multi_reduction <add>, %39, %cst_22 [1] : vector<8x8xf32> to vector<8xf32>
    %41 = vector.shape_cast %40 : vector<8xf32> to vector<8x1xf32>
    %42 = vector.broadcast %41 : vector<8x1xf32> to vector<8x8xf32>
    %43 = arith.divf %39, %42 : vector<8x8xf32>
    %c0_23 = arith.constant 0 : index
    %c1 = arith.constant 1 : index
    %c0_24 = arith.constant 0 : index
    %c0_25 = arith.constant 0 : index
    %44 = vector.load %arg6[%c0_23, %c1, %c0_24, %c0_25] : memref<1x4x8x8xf32, #tpu.memory_space<vmem>>, vector<1x1x8x8xf32>
    %45 = vector.shape_cast %44 : vector<1x1x8x8xf32> to vector<8x8xf32>
    %46 = vector.shape_cast %43 : vector<8x8xf32> to vector<1x1x8x8xf32>
    tpu.vector_store %arg6[%c0_23, %c1, %c0_24, %c0_25], %46 {strides = array<i32>} : memref<1x4x8x8xf32, #tpu.memory_space<vmem>>, vector<1x1x8x8xf32>,
    %47 = arith.truncf %43 : vector<8x8xf32> to vector<8x8xbf16>
    %cst_26 = arith.constant dense<0.000000e+00> : vector<8x8xf32>
    %48 = tpu.matmul %47, %32, %cst_26 {dimension_numbers = #tpu.dot_dimension_numbers<[1], [0], [0], [1], [0, 0, 1, 1], [], []>} : vector<8x8xbf16>, vector<8x8xbf16>, vector<8x8xf32> -> vector<8x8xf32>
    %49 = arith.truncf %48 : vector<8x8xf32> to vector<8x8xbf16>
    %c0_27 = arith.constant 0 : index
    %c0_28 = arith.constant 0 : index
    %c8 = arith.constant 8 : index
    %50 = vector.load %arg5[%c0_27, %c0_28, %c8] : memref<1x8x32xbf16, #tpu.memory_space<vmem>>, vector<1x8x8xbf16>
    %51 = vector.shape_cast %50 : vector<1x8x8xbf16> to vector<8x8xbf16>
    %52 = vector.shape_cast %49 : vector<8x8xbf16> to vector<1x8x8xbf16>
    tpu.vector_store %arg5[%c0_27, %c0_28, %c8], %52 {strides = array<i32>} : memref<1x8x32xbf16, #tpu.memory_space<vmem>>, vector<1x8x8xbf16>,
    %53 = vector.extract_strided_slice %1 {offsets = [0, 16], sizes = [8, 8], strides = [1, 1]} : vector<8x32xbf16> to vector<8x8xbf16>
    %54 = vector.extract_strided_slice %3 {offsets = [0, 16], sizes = [8, 8], strides = [1, 1]} : vector<8x32xbf16> to vector<8x8xbf16>
    %55 = vector.extract_strided_slice %5 {offsets = [0, 16], sizes = [8, 8], strides = [1, 1]} : vector<8x32xbf16> to vector<8x8xbf16>
    %cst_29 = arith.constant dense<0.000000e+00> : vector<8x8xf32>
    %56 = tpu.matmul %53, %54, %cst_29 {dimension_numbers = #tpu.dot_dimension_numbers<[1], [1], [0], [0], [0, 0, 1, 0], [], []>} : vector<8x8xbf16>, vector<8x8xbf16>, vector<8x8xf32> -> vector<8x8xf32>
    %57 = arith.addf %56, %6 : vector<8x8xf32>
    %cst_30 = arith.constant dense<0xFF800000> : vector<8xf32>
    %58 = vector.multi_reduction <maximumf>, %57, %cst_30 [1] : vector<8x8xf32> to vector<8xf32>
    %59 = vector.shape_cast %58 : vector<8xf32> to vector<8x1xf32>
    %60 = vector.broadcast %59 : vector<8x1xf32> to vector<8x8xf32>
    %61 = arith.subf %57, %60 : vector<8x8xf32>
    %62 = math.exp %61 : vector<8x8xf32>
    %cst_31 = arith.constant dense<0.000000e+00> : vector<8xf32>
    %63 = vector.multi_reduction <add>, %62, %cst_31 [1] : vector<8x8xf32> to vector<8xf32>
    %64 = vector.shape_cast %63 : vector<8xf32> to vector<8x1xf32>
    %65 = vector.broadcast %64 : vector<8x1xf32> to vector<8x8xf32>
    %66 = arith.divf %62, %65 : vector<8x8xf32>
    %c0_32 = arith.constant 0 : index
    %c2 = arith.constant 2 : index
    %c0_33 = arith.constant 0 : index
    %c0_34 = arith.constant 0 : index
    %67 = vector.load %arg6[%c0_32, %c2, %c0_33, %c0_34] : memref<1x4x8x8xf32, #tpu.memory_space<vmem>>, vector<1x1x8x8xf32>
    %68 = vector.shape_cast %67 : vector<1x1x8x8xf32> to vector<8x8xf32>
    %69 = vector.shape_cast %66 : vector<8x8xf32> to vector<1x1x8x8xf32>
    tpu.vector_store %arg6[%c0_32, %c2, %c0_33, %c0_34], %69 {strides = array<i32>} : memref<1x4x8x8xf32, #tpu.memory_space<vmem>>, vector<1x1x8x8xf32>,
    %70 = arith.truncf %66 : vector<8x8xf32> to vector<8x8xbf16>
    %cst_35 = arith.constant dense<0.000000e+00> : vector<8x8xf32>
    %71 = tpu.matmul %70, %55, %cst_35 {dimension_numbers = #tpu.dot_dimension_numbers<[1], [0], [0], [1], [0, 0, 1, 1], [], []>} : vector<8x8xbf16>, vector<8x8xbf16>, vector<8x8xf32> -> vector<8x8xf32>
    %72 = arith.truncf %71 : vector<8x8xf32> to vector<8x8xbf16>
    %c0_36 = arith.constant 0 : index
    %c0_37 = arith.constant 0 : index
    %c16 = arith.constant 16 : index
    %73 = vector.load %arg5[%c0_36, %c0_37, %c16] : memref<1x8x32xbf16, #tpu.memory_space<vmem>>, vector<1x8x8xbf16>
    %74 = vector.shape_cast %73 : vector<1x8x8xbf16> to vector<8x8xbf16>
    %75 = vector.shape_cast %72 : vector<8x8xbf16> to vector<1x8x8xbf16>
    tpu.vector_store %arg5[%c0_36, %c0_37, %c16], %75 {strides = array<i32>} : memref<1x8x32xbf16, #tpu.memory_space<vmem>>, vector<1x8x8xbf16>,
    %76 = vector.extract_strided_slice %1 {offsets = [0, 24], sizes = [8, 8], strides = [1, 1]} : vector<8x32xbf16> to vector<8x8xbf16>
    %77 = vector.extract_strided_slice %3 {offsets = [0, 24], sizes = [8, 8], strides = [1, 1]} : vector<8x32xbf16> to vector<8x8xbf16>
    %78 = vector.extract_strided_slice %5 {offsets = [0, 24], sizes = [8, 8], strides = [1, 1]} : vector<8x32xbf16> to vector<8x8xbf16>
    %cst_38 = arith.constant dense<0.000000e+00> : vector<8x8xf32>
    %79 = tpu.matmul %76, %77, %cst_38 {dimension_numbers = #tpu.dot_dimension_numbers<[1], [1], [0], [0], [0, 0, 1, 0], [], []>} : vector<8x8xbf16>, vector<8x8xbf16>, vector<8x8xf32> -> vector<8x8xf32>
    %80 = arith.addf %79, %6 : vector<8x8xf32>
    %cst_39 = arith.constant dense<0xFF800000> : vector<8xf32>
    %81 = vector.multi_reduction <maximumf>, %80, %cst_39 [1] : vector<8x8xf32> to vector<8xf32>
    %82 = vector.shape_cast %81 : vector<8xf32> to vector<8x1xf32>
    %83 = vector.broadcast %82 : vector<8x1xf32> to vector<8x8xf32>
    %84 = arith.subf %80, %83 : vector<8x8xf32>
    %85 = math.exp %84 : vector<8x8xf32>
    %cst_40 = arith.constant dense<0.000000e+00> : vector<8xf32>
    %86 = vector.multi_reduction <add>, %85, %cst_40 [1] : vector<8x8xf32> to vector<8xf32>
    %87 = vector.shape_cast %86 : vector<8xf32> to vector<8x1xf32>
    %88 = vector.broadcast %87 : vector<8x1xf32> to vector<8x8xf32>
    %89 = arith.divf %85, %88 : vector<8x8xf32>
    %c0_41 = arith.constant 0 : index
    %c3 = arith.constant 3 : index
    %c0_42 = arith.constant 0 : index
    %c0_43 = arith.constant 0 : index
    %90 = vector.load %arg6[%c0_41, %c3, %c0_42, %c0_43] : memref<1x4x8x8xf32, #tpu.memory_space<vmem>>, vector<1x1x8x8xf32>
    %91 = vector.shape_cast %90 : vector<1x1x8x8xf32> to vector<8x8xf32>
    %92 = vector.shape_cast %89 : vector<8x8xf32> to vector<1x1x8x8xf32>
    tpu.vector_store %arg6[%c0_41, %c3, %c0_42, %c0_43], %92 {strides = array<i32>} : memref<1x4x8x8xf32, #tpu.memory_space<vmem>>, vector<1x1x8x8xf32>,
    %93 = arith.truncf %89 : vector<8x8xf32> to vector<8x8xbf16>
    %cst_44 = arith.constant dense<0.000000e+00> : vector<8x8xf32>
    %94 = tpu.matmul %93, %78, %cst_44 {dimension_numbers = #tpu.dot_dimension_numbers<[1], [0], [0], [1], [0, 0, 1, 1], [], []>} : vector<8x8xbf16>, vector<8x8xbf16>, vector<8x8xf32> -> vector<8x8xf32>
    %95 = arith.truncf %94 : vector<8x8xf32> to vector<8x8xbf16>
    %c0_45 = arith.constant 0 : index
    %c0_46 = arith.constant 0 : index
    %c24 = arith.constant 24 : index
    %96 = vector.load %arg5[%c0_45, %c0_46, %c24] : memref<1x8x32xbf16, #tpu.memory_space<vmem>>, vector<1x8x8xbf16>
    %97 = vector.shape_cast %96 : vector<1x8x8xbf16> to vector<8x8xbf16>
    %98 = vector.shape_cast %95 : vector<8x8xbf16> to vector<1x8x8xbf16>
    tpu.vector_store %arg5[%c0_45, %c0_46, %c24], %98 {strides = array<i32>} : memref<1x8x32xbf16, #tpu.memory_space<vmem>>, vector<1x8x8xbf16>,
    return
  }
  func.func @transform_0(%arg0: i32) -> (i32, i32, i32) {
    %c0_i32 = arith.constant 0 : i32
    %c0_i32_0 = arith.constant 0 : i32
    %c0_i32_1 = arith.constant 0 : i32
    return %arg0, %c0_i32, %c0_i32_0 : i32, i32, i32
  }
  func.func @transform_1(%arg0: i32) -> (i32, i32, i32) {
    %c0_i32 = arith.constant 0 : i32
    %c0_i32_0 = arith.constant 0 : i32
    %c0_i32_1 = arith.constant 0 : i32
    return %arg0, %c0_i32, %c0_i32_0 : i32, i32, i32
  }
  func.func @transform_2(%arg0: i32) -> (i32, i32, i32) {
    %c0_i32 = arith.constant 0 : i32
    %c0_i32_0 = arith.constant 0 : i32
    %c0_i32_1 = arith.constant 0 : i32
    return %arg0, %c0_i32, %c0_i32_0 : i32, i32, i32
  }
  func.func @transform_3(%arg0: i32) -> (i32, i32) {
    %c0_i32 = arith.constant 0 : i32
    %c0_i32_0 = arith.constant 0 : i32
    %c0_i32_1 = arith.constant 0 : i32
    return %c0_i32, %c0_i32_0 : i32, i32
  }
  func.func @transform_4(%arg0: i32) -> (i32, i32, i32) {
    %c0_i32 = arith.constant 0 : i32
    %c0_i32_0 = arith.constant 0 : i32
    %c0_i32_1 = arith.constant 0 : i32
    return %arg0, %c0_i32, %c0_i32_0 : i32, i32, i32
  }
  func.func @transform_5(%arg0: i32) -> (i32, i32, i32, i32) {
    %c0_i32 = arith.constant 0 : i32
    %c0_i32_0 = arith.constant 0 : i32
    %c0_i32_1 = arith.constant 0 : i32
    %c0_i32_2 = arith.constant 0 : i32
    return %arg0, %c0_i32, %c0_i32_0, %c0_i32_1 : i32, i32, i32, i32
  }
}

module attributes {stable_mosaic.version = 11 : i64} {
  func.func @_layernorm_res_kernel(%arg0: i32, %arg1: memref<16x32xbf16, #tpu.memory_space<vmem>>, %arg2: memref<16x32xbf16, #tpu.memory_space<vmem>>, %arg3: memref<1x32xf32, #tpu.memory_space<vmem>>, %arg4: memref<1x32xf32, #tpu.memory_space<vmem>>, %arg5: memref<16x32xbf16, #tpu.memory_space<vmem>>) attributes {dimension_semantics = [#tpu.dimension_semantics<parallel>], iteration_bounds = array<i64: 1>, scalar_prefetch = 0 : i64, scratch_operands = 0 : i64, tpu.core_type = #tpu.core_type<tc>, window_params = [{transform_indices = @transform_0, window_bounds = array<i64: 16, 32>}, {transform_indices = @transform_1, window_bounds = array<i64: 16, 32>}, {pipeline_mode = #tpu.pipeline_mode<synchronous>, transform_indices = @transform_2, window_bounds = array<i64: 1, 32>}, {pipeline_mode = #tpu.pipeline_mode<synchronous>, transform_indices = @transform_3, window_bounds = array<i64: 1, 32>}, {transform_indices = @transform_4, window_bounds = array<i64: 16, 32>}]} {
    %c0 = arith.constant 0 : index
    %c0_0 = arith.constant 0 : index
    %0 = vector.load %arg1[%c0, %c0_0] : memref<16x32xbf16, #tpu.memory_space<vmem>>, vector<16x32xbf16>
    %1 = arith.extf %0 : vector<16x32xbf16> to vector<16x32xf32>
    %c0_1 = arith.constant 0 : index
    %c0_2 = arith.constant 0 : index
    %2 = vector.load %arg2[%c0_1, %c0_2] : memref<16x32xbf16, #tpu.memory_space<vmem>>, vector<16x32xbf16>
    %3 = arith.extf %2 : vector<16x32xbf16> to vector<16x32xf32>
    %4 = arith.addf %1, %3 : vector<16x32xf32>
    %cst = arith.constant dense<0.000000e+00> : vector<16xf32>
    %5 = vector.multi_reduction <add>, %4, %cst [1] : vector<16x32xf32> to vector<16xf32>
    %6 = vector.shape_cast %5 : vector<16xf32> to vector<16x1xf32>
    %cst_3 = arith.constant 3.200000e+01 : f32
    %7 = vector.broadcast %cst_3 : f32 to vector<16x1xf32>
    %8 = arith.divf %6, %7 : vector<16x1xf32>
    %9 = vector.broadcast %8 : vector<16x1xf32> to vector<16x32xf32>
    %10 = arith.subf %4, %9 : vector<16x32xf32>
    %11 = arith.mulf %10, %10 : vector<16x32xf32>
    %cst_4 = arith.constant dense<0.000000e+00> : vector<16xf32>
    %12 = vector.multi_reduction <add>, %11, %cst_4 [1] : vector<16x32xf32> to vector<16xf32>
    %13 = vector.shape_cast %12 : vector<16xf32> to vector<16x1xf32>
    %cst_5 = arith.constant 3.200000e+01 : f32
    %14 = vector.broadcast %cst_5 : f32 to vector<16x1xf32>
    %15 = arith.divf %13, %14 : vector<16x1xf32>
    %16 = vector.broadcast %8 : vector<16x1xf32> to vector<16x32xf32>
    %17 = arith.subf %4, %16 : vector<16x32xf32>
    %cst_6 = arith.constant 9.99999974E-6 : f32
    %18 = vector.broadcast %cst_6 : f32 to vector<16x1xf32>
    %19 = arith.addf %15, %18 : vector<16x1xf32>
    %20 = math.rsqrt %19 : vector<16x1xf32>
    %21 = vector.broadcast %20 : vector<16x1xf32> to vector<16x32xf32>
    %22 = arith.mulf %17, %21 : vector<16x32xf32>
    %c0_7 = arith.constant 0 : index
    %c0_8 = arith.constant 0 : index
    %23 = vector.load %arg3[%c0_7, %c0_8] : memref<1x32xf32, #tpu.memory_space<vmem>>, vector<1x32xf32>
    %24 = vector.broadcast %23 : vector<1x32xf32> to vector<16x32xf32>
    %25 = arith.mulf %22, %24 : vector<16x32xf32>
    %c0_9 = arith.constant 0 : index
    %c0_10 = arith.constant 0 : index
    %26 = vector.load %arg4[%c0_9, %c0_10] : memref<1x32xf32, #tpu.memory_space<vmem>>, vector<1x32xf32>
    %27 = vector.broadcast %26 : vector<1x32xf32> to vector<16x32xf32>
    %28 = arith.addf %25, %27 : vector<16x32xf32>
    %29 = arith.truncf %28 : vector<16x32xf32> to vector<16x32xbf16>
    %c0_11 = arith.constant 0 : index
    %c0_12 = arith.constant 0 : index
    %30 = vector.load %arg5[%c0_11, %c0_12] : memref<16x32xbf16, #tpu.memory_space<vmem>>, vector<16x32xbf16>
    tpu.vector_store %arg5[%c0_11, %c0_12], %29 {strides = array<i32>} : memref<16x32xbf16, #tpu.memory_space<vmem>>, vector<16x32xbf16>,
    return
  }
  func.func @transform_0(%arg0: i32) -> (i32, i32) {
    %c0_i32 = arith.constant 0 : i32
    %c0_i32_0 = arith.constant 0 : i32
    return %arg0, %c0_i32 : i32, i32
  }
  func.func @transform_1(%arg0: i32) -> (i32, i32) {
    %c0_i32 = arith.constant 0 : i32
    %c0_i32_0 = arith.constant 0 : i32
    return %arg0, %c0_i32 : i32, i32
  }
  func.func @transform_2(%arg0: i32) -> (i32, i32) {
    %c0_i32 = arith.constant 0 : i32
    %c0_i32_0 = arith.constant 0 : i32
    %c0_i32_1 = arith.constant 0 : i32
    return %c0_i32, %c0_i32_0 : i32, i32
  }
  func.func @transform_3(%arg0: i32) -> (i32, i32) {
    %c0_i32 = arith.constant 0 : i32
    %c0_i32_0 = arith.constant 0 : i32
    %c0_i32_1 = arith.constant 0 : i32
    return %c0_i32, %c0_i32_0 : i32, i32
  }
  func.func @transform_4(%arg0: i32) -> (i32, i32) {
    %c0_i32 = arith.constant 0 : i32
    %c0_i32_0 = arith.constant 0 : i32
    return %arg0, %c0_i32 : i32, i32
  }
}

module attributes {stable_mosaic.version = 11 : i64} {
  func.func @_matmul_bias_kernel(%arg0: i32, %arg1: i32, %arg2: i32, %arg3: memref<16x128xbf16, #tpu.memory_space<vmem>>, %arg4: memref<128x128xbf16, #tpu.memory_space<vmem>>, %arg5: memref<1x128xf32, #tpu.memory_space<vmem>>, %arg6: memref<16x128xf32, #tpu.memory_space<vmem>>, %arg7: memref<16x128xf32, #tpu.memory_space<vmem>>) attributes {dimension_semantics = [#tpu.dimension_semantics<parallel>, #tpu.dimension_semantics<parallel>, #tpu.dimension_semantics<arbitrary>], iteration_bounds = array<i64: 1, 1, 1>, scalar_prefetch = 0 : i64, scratch_operands = 1 : i64, tpu.core_type = #tpu.core_type<tc>, window_params = [{transform_indices = @transform_0, window_bounds = array<i64: 16, 128>}, {transform_indices = @transform_1, window_bounds = array<i64: 128, 128>}, {transform_indices = @transform_2, window_bounds = array<i64: 1, 128>}, {transform_indices = @transform_3, window_bounds = array<i64: 16, 128>}]} {
    %c0_i32 = arith.constant 0 : i32
    %0 = arith.cmpi eq, %arg2, %c0_i32 : i32
    %1 = arith.extui %0 : i1 to i32
    %c0_i32_0 = arith.constant 0 : i32
    %2 = arith.cmpi ne, %1, %c0_i32_0 : i32
    scf.if %2 {
      %cst_10 = arith.constant 0.000000e+00 : f32
      %12 = vector.broadcast %cst_10 : f32 to vector<16x128xf32>
      %c0_11 = arith.constant 0 : index
      %c0_12 = arith.constant 0 : index
      %13 = vector.load %arg7[%c0_11, %c0_12] : memref<16x128xf32, #tpu.memory_space<vmem>>, vector<16x128xf32>
      tpu.vector_store %arg7[%c0_11, %c0_12], %12 {strides = array<i32>} : memref<16x128xf32, #tpu.memory_space<vmem>>, vector<16x128xf32>,
    } else {
    }
    %c0 = arith.constant 0 : index
    %c0_1 = arith.constant 0 : index
    %3 = vector.load %arg7[%c0, %c0_1] : memref<16x128xf32, #tpu.memory_space<vmem>>, vector<16x128xf32>
    %c0_2 = arith.constant 0 : index
    %c0_3 = arith.constant 0 : index
    %4 = vector.load %arg3[%c0_2, %c0_3] : memref<16x128xbf16, #tpu.memory_space<vmem>>, vector<16x128xbf16>
    %c0_4 = arith.constant 0 : index
    %c0_5 = arith.constant 0 : index
    %5 = vector.load %arg4[%c0_4, %c0_5] : memref<128x128xbf16, #tpu.memory_space<vmem>>, vector<128x128xbf16>
    %cst = arith.constant dense<0.000000e+00> : vector<16x128xf32>
    %6 = tpu.matmul %4, %5, %cst {dimension_numbers = #tpu.dot_dimension_numbers<[1], [0], [0], [1], [0, 0, 1, 1], [], []>} : vector<16x128xbf16>, vector<128x128xbf16>, vector<16x128xf32> -> vector<16x128xf32>
    %7 = arith.addf %3, %6 : vector<16x128xf32>
    %c0_6 = arith.constant 0 : index
    %c0_7 = arith.constant 0 : index
    %8 = vector.load %arg7[%c0_6, %c0_7] : memref<16x128xf32, #tpu.memory_space<vmem>>, vector<16x128xf32>
    tpu.vector_store %arg7[%c0_6, %c0_7], %7 {strides = array<i32>} : memref<16x128xf32, #tpu.memory_space<vmem>>, vector<16x128xf32>,
    %c0_i32_8 = arith.constant 0 : i32
    %9 = arith.cmpi eq, %arg2, %c0_i32_8 : i32
    %10 = arith.extui %9 : i1 to i32
    %c0_i32_9 = arith.constant 0 : i32
    %11 = arith.cmpi ne, %10, %c0_i32_9 : i32
    scf.if %11 {
      %c0_10 = arith.constant 0 : index
      %c0_11 = arith.constant 0 : index
      %12 = vector.load %arg7[%c0_10, %c0_11] : memref<16x128xf32, #tpu.memory_space<vmem>>, vector<16x128xf32>
      %c0_12 = arith.constant 0 : index
      %c0_13 = arith.constant 0 : index
      %13 = vector.load %arg5[%c0_12, %c0_13] : memref<1x128xf32, #tpu.memory_space<vmem>>, vector<1x128xf32>
      %14 = vector.broadcast %13 : vector<1x128xf32> to vector<16x128xf32>
      %15 = arith.addf %12, %14 : vector<16x128xf32>
      %c0_14 = arith.constant 0 : index
      %c0_15 = arith.constant 0 : index
      %16 = vector.load %arg6[%c0_14, %c0_15] : memref<16x128xf32, #tpu.memory_space<vmem>>, vector<16x128xf32>
      tpu.vector_store %arg6[%c0_14, %c0_15], %15 {strides = array<i32>} : memref<16x128xf32, #tpu.memory_space<vmem>>, vector<16x128xf32>,
    } else {
    }
    return
  }
  func.func @transform_0(%arg0: i32, %arg1: i32, %arg2: i32) -> (i32, i32) {
    %c0_i32 = arith.constant 0 : i32
    return %arg0, %arg2 : i32, i32
  }
  func.func @transform_1(%arg0: i32, %arg1: i32, %arg2: i32) -> (i32, i32) {
    %c0_i32 = arith.constant 0 : i32
    return %arg2, %arg1 : i32, i32
  }
  func.func @transform_2(%arg0: i32, %arg1: i32, %arg2: i32) -> (i32, i32) {
    %c0_i32 = arith.constant 0 : i32
    %c0_i32_0 = arith.constant 0 : i32
    return %c0_i32, %arg1 : i32, i32
  }
  func.func @transform_3(%arg0: i32, %arg1: i32, %arg2: i32) -> (i32, i32) {
    %c0_i32 = arith.constant 0 : i32
    return %arg0, %arg1 : i32, i32
  }
}

</mosaic_0001>

<bundles_post_ra>
// kernel: decoder_forward.39
= control target key start
LH: loop header
LB: loop body
LE: loop exit
PB: predicated region body
PF: predicated region fallthrough
CT: control target
= control target key end

     0   :  { %8 = vsyncpa [#allocation4], 0  ;;  %s228_s15 = smov [#allocation3]   ;;  %s229_s17 = smov 64   ;;  %s263_s0 = inlined_call_operand.vmem [shape: bf16[16,128], index: 0, kind: input, shape index: {}]   ;;  %s264_s1 = inlined_call_operand.hbm [shape: bf16[128,128], index: 1, kind: input, shape index: {}]   ;;  %s265_s2 = inlined_call_operand.vmem [shape: f32[1,128], index: 2, kind: input, shape index: {}]   ;;  %s266_s3 = inlined_call_operand.vmem [shape: bf16[16,128], index: 3, kind: output, shape index: {}]  }
   0x1   :  { %s15_s14 = sshll.u32 %s264_s1, 4  ;;  %s17_s16 = sshll.u32 %s228_s15, 4  ;;  %s16_s14 = int_to_ptr.hbm [resolvable:$true] %s15_s14  ;;  %s18_s16 = int_to_ptr.vmem [resolvable:$true] %s17_s16 }
   0x2   :  { %s230_s18 = smov 4  }
   0x3   :  { %23 = dma.hbm_to_vmem [thread:$0]  %s16_s14, 1024, %s18_s16, [#allocation4], %s229_s17, %s229_s17, %s230_s18  }
   0x4   :  { %226 = dma.done.wait [#allocation4], 1024  }
   0x5   :  { %227 = vsyncadd [#allocation4], 4294966272  ;;  %v192_v0 = vld [vmem:[#allocation3 + $0x38] sm:$0xff]  ;;  %v191_v1 = vld [vmem:[#allocation3 + $0x30] sm:$0xff] }
   0x6   :  { %110 = vmatpush.bf16.msra.mxu0 %v192_v0  ;;  %v190_v2 = vld [vmem:[#allocation3 + $0x28] sm:$0xff]  ;;  %v189_v3 = vld [vmem:[#allocation3 + $0x20] sm:$0xff]  ;;  %v188_v4 = vld [vmem:[#allocation3 + $0x18] sm:$0xff] }
   0x7   :  { %v187_v5 = vld [vmem:[#allocation3 + $0x10] sm:$0xff]  ;;  %v186_v6 = vld [vmem:[#allocation3 + $0x8] sm:$0xff]  ;;  %v185_v7 = vld [vmem:[#allocation3] sm:$0xff] }
   0x8   :  { %v184_v8 = vld [vmem:[%s263_s0] sm:$0xff] }
   0x9   :  { %v201_v10 = vld [vmem:[%s265_s2] ss:$0 sm:$0xff] }
   0xa   :  { %111 = vmatpush.bf16.msra.mxu0 %v191_v1 }
   0xe   :  { %112 = vmatpush.bf16.msra.mxu0 %v190_v2 }
  0x12   :  { %113 = vmatpush.bf16.msra.mxu0 %v189_v3 }
  0x16   :  { %114 = vmatpush.bf16.msra.mxu0 %v188_v4 }
  0x1a   :  { %115 = vmatpush.bf16.msra.mxu0 %v187_v5 }
  0x1e   :  { %116 = vmatpush.bf16.msra.mxu0 %v186_v6 }
  0x22   :  { %117 = vmatpush.bf16.msra.mxu0 %v185_v7 }
  0x25   :  { %118 = vmatmul.bf16.vlgmr.msra.gmra.mxu0 %v184_v8 }
  0xa2   :  { %v119_v9 = vpop.f32.mrf.mxu0 }
  0xa3   :  { %v137_v12 = vadd.f32 %v201_v10, %v119_v9 }
  0xaa   :  { %v121_v11 = vpop.f32.mrf.mxu0 }
  0xab   :  { %v138_v13 = vadd.f32 %v201_v10, %v121_v11 }
  0xad   :  { %v196_v14 = vpack.c.bf16 %v138_v13, %v137_v12 }
  0xaf   :  { %197 = vst [vmem:[%s266_s3] sm:$0xff] %v196_v14  }
  0xb0   :  { %147 = vsyncpa [#allocation4], 1 }

// kernel: decoder_forward.23
= control target key start
LH: loop header
LB: loop body
LE: loop exit
PB: predicated region body
PF: predicated region fallthrough
CT: control target
= control target key end

     0   :  { %s235_s1 = inlined_call_operand.vmem [shape: bf16[128,128], index: 1, kind: input, shape index: {}]   ;;  %s236_s2 = inlined_call_operand.vmem [shape: f32[1,128], index: 2, kind: input, shape index: {}]   ;;  %s237_s0 = inlined_call_operand.vmem [shape: bf16[16,128], index: 0, kind: input, shape index: {}]   ;;  %s238_s3 = inlined_call_operand.vmem [shape: bf16[16,128], index: 3, kind: output, shape index: {}]  }
   0x1   :  { %v175_v0 = vld [vmem:[%s235_s1 + $0x38] sm:$0xff]  ;;  %v174_v1 = vld [vmem:[%s235_s1 + $0x30] sm:$0xff]  ;;  %v173_v2 = vld [vmem:[%s235_s1 + $0x28] sm:$0xff] }
   0x2   :  { %94 = vmatpush.bf16.msra.mxu0 %v175_v0  ;;  %v172_v3 = vld [vmem:[%s235_s1 + $0x20] sm:$0xff]  ;;  %v171_v4 = vld [vmem:[%s235_s1 + $0x18] sm:$0xff]  ;;  %v170_v5 = vld [vmem:[%s235_s1 + $0x10] sm:$0xff] }
   0x3   :  { %v169_v6 = vld [vmem:[%s235_s1 + $0x8] sm:$0xff]  ;;  %v168_v7 = vld [vmem:[%s235_s1] sm:$0xff] }
   0x4   :  { %v167_v8 = vld [vmem:[%s237_s0] sm:$0xff] }
   0x5   :  { %v181_v10 = vld [vmem:[%s236_s2] ss:$0 sm:$0xff] }
   0x6   :  { %95 = vmatpush.bf16.msra.mxu0 %v174_v1 }
   0xa   :  { %96 = vmatpush.bf16.msra.mxu0 %v173_v2 }
   0xe   :  { %97 = vmatpush.bf16.msra.mxu0 %v172_v3 }
  0x12   :  { %98 = vmatpush.bf16.msra.mxu0 %v171_v4 }
  0x16   :  { %99 = vmatpush.bf16.msra.mxu0 %v170_v5 }
  0x1a   :  { %100 = vmatpush.bf16.msra.mxu0 %v169_v6 }
  0x1e   :  { %101 = vmatpush.bf16.msra.mxu0 %v168_v7 }
  0x21   :  { %102 = vmatmul.bf16.vlgmr.msra.gmra.mxu0 %v167_v8 }
  0x9e   :  { %v103_v9 = vpop.f32.mrf.mxu0 }
  0x9f   :  { %v121_v12 = vadd.f32 %v181_v10, %v103_v9 }
  0xa6   :  { %v105_v11 = vpop.f32.mrf.mxu0 }
  0xa7   :  { %v122_v13 = vadd.f32 %v181_v10, %v105_v11 }
  0xa9   :  { %v179_v14 = vpack.c.bf16 %v122_v13, %v121_v12 }
  0xab   :  { %180 = vst [vmem:[%s238_s3] sm:$0xff] %v179_v14  }

// kernel: decoder_forward.26
= control target key start
LH: loop header
LB: loop body
LE: loop exit
PB: predicated region body
PF: predicated region fallthrough
CT: control target
= control target key end

     0   :  { %vm27_vm0 = vcmask 261120   ;;  %v117_v10 = vmov 32.0   ;;  %vm93_vm6 = vcmask 257024   ;;  %s165_s0 = inlined_call_operand.vmem [shape: bf16[16,32], index: 0, kind: input, shape index: {}]   ;;  %s166_s1 = inlined_call_operand.vmem [shape: bf16[16,32], index: 1, kind: input, shape index: {}]   ;;  %s167_s2 = inlined_call_operand.vmem [shape: f32[1,32], index: 2, kind: input, shape index: {}]   ;;  %s168_s3 = inlined_call_operand.vmem [shape: f32[1,32], index: 3, kind: input, shape index: {}]   ;;  %s169_s4 = inlined_call_operand.vmem [shape: bf16[16,32], index: 4, kind: output, shape index: {}]  }
   0x1   :  { %v101_v0 = vld [vmem:[%s165_s0] sm:$0xff]   ;;  %111 = vrcp.f32 %v117_v10 }
   0x2   :  { %v105_v1 = vld [vmem:[%s166_s1] sm:$0xff]   ;;  %v102_v2 = vunpack.c.l.bf16 %v101_v0  ;;  %v103_v5 = vunpack.c.h.bf16 %v101_v0 }
   0x3   :  { %v106_v3 = vunpack.c.l.bf16 %v105_v1  ;;  %v107_v6 = vunpack.c.h.bf16 %v105_v1  ;;  %v109_v41 = vld [vmem:[%s167_s2] ss:$0 sm:$0xff] }
   0x4   :  { %v110_v44 = vld [vmem:[%s168_s3] ss:$0 sm:$0xff] }
   0x5   :  { %v25_v4 = vadd.f32 %v106_v3, %v102_v2  ;;  %v26_v8 = vadd.f32 %v107_v6, %v103_v5 }
   0x7   :  { %v28_v7 = vsel %vm27_vm0, %v25_v4, 0.0  ;;  %v31_v9 = vsel %vm27_vm0, %v26_v8, 0.0  ;;  %v112_v11 = vpop.eup %111 }
   0x8   :  { %29 = vadd.xlane.f32.xlu0 %v28_v7  ;;  %v35_v12 = vmul.f32 32.0, %v112_v11  ;;  %vm39_vm1 = vweird.f32 %v112_v11 }
   0xa   :  { %v36_v13 = vsub.f32 1.0, %v35_v12 }
   0xc   :  { %v37_v14 = vmul.f32 %v112_v11, %v36_v13 }
   0xe   :  { %v38_v15 = vadd.f32 %v112_v11, %v37_v14 }
  0x10   :  { %32 = vadd.xlane.f32.xlu0 %v31_v9  ;;  %v40_v16 = vsel %vm39_vm1, %v112_v11, %v38_v15 }
  0x7b   :  { %v30_v17 = vpop.xlane.xlu0 %29 }
  0x7c   :  { %v41_v18 = vmul.f32 %v40_v16, %v30_v17 }
  0x7e   :  { %v43_v19 = vsub.f32 %v25_v4, %v41_v18 }
  0x80   :  { %v45_v20 = vmul.f32 %v43_v19, %v43_v19 }
  0x82   :  { %v47_v21 = vsel %vm27_vm0, %v45_v20, 0.0 }
  0x83   :  { %48 = vadd.xlane.f32.xlu1 %v47_v21  ;;  %v33_v22 = vpop.xlane.xlu0 %32 }
  0x84   :  { %v42_v23 = vmul.f32 %v40_v16, %v33_v22 }
  0x86   :  { %v44_v24 = vsub.f32 %v26_v8, %v42_v23 }
  0x88   :  { %v46_v25 = vmul.f32 %v44_v24, %v44_v24 }
  0x8a   :  { %v50_v26 = vsel %vm27_vm0, %v46_v25, 0.0 }
  0x8b   :  { %51 = vadd.xlane.f32.xlu1 %v50_v26 }
  0xf6   :  { %v49_v27 = vpop.xlane.xlu1 %48 }
  0xf7   :  { %v53_v28 = vmul.f32 %v49_v27, %v40_v16 }
  0xf9   :  { %v55_v29 = vadd.f32 1e-05, %v53_v28 }
  0xfb   :  { %113 = vrsqrt.f32 %v55_v29  ;;  %vm63_vm3 = vweird.f32 %v55_v29 }
  0xfe   :  { %v52_v30 = vpop.xlane.xlu1 %51 }
  0xff   :  { %v54_v31 = vmul.f32 %v52_v30, %v40_v16 }
 0x101   :  { %v114_v32 = vpop.eup %113  ;;  %v56_v33 = vadd.f32 1e-05, %v54_v31 }
 0x102   :  { %v58_v34 = vmul.f32 %v114_v32, %v55_v29  ;;  %vm64_vm2 = vweird.f32 %v114_v32 }
 0x103   :  { %115 = vrsqrt.f32 %v56_v33  ;;  %vm65_vm4 = vmor %vm63_vm3, %vm64_vm2  ;;  %vm73_vm7 = vweird.f32 %v56_v33 }
 0x104   :  { %v59_v35 = vmul.f32 %v114_v32, %v58_v34 }
 0x106   :  { %v60_v36 = vmul.f32 0.5, %v59_v35 }
 0x108   :  { %v61_v37 = vsub.f32 1.5, %v60_v36 }
 0x109   :  { %v116_v38 = vpop.eup %115 }
 0x10a   :  { %v62_v39 = vmul.f32 %v114_v32, %v61_v37  ;;  %v68_v40 = vmul.f32 %v116_v38, %v56_v33  ;;  %vm74_vm5 = vweird.f32 %v116_v38 }
 0x10b   :  { %vm75_vm8 = vmor %vm73_vm7, %vm74_vm5 }
 0x10c   :  { %v66_v42 = vsel %vm65_vm4, %v114_v32, %v62_v39  ;;  %v69_v43 = vmul.f32 %v116_v38, %v68_v40 }
 0x10d   :  { %v77_v45 = vmul.f32 %v66_v42, %v43_v19 }
 0x10e   :  { %v70_v46 = vmul.f32 0.5, %v69_v43 }
 0x10f   :  { %v83_v47 = vmul.f32 %v109_v41, %v77_v45 }
 0x110   :  { %v71_v48 = vsub.f32 1.5, %v70_v46 }
 0x111   :  { %v89_v49 = vadd.f32 %v110_v44, %v83_v47 }
 0x112   :  { %v72_v50 = vmul.f32 %v116_v38, %v71_v48 }
 0x113   :  { %v91_v51 = vpack.c.bf16 %v89_v49, %v89_v49 }
 0x114   :  { %v76_v52 = vsel %vm75_vm8, %v116_v38, %v72_v50 }
 0x115   :  { %94 = vst.msk [vmem:[%s169_s4] sm:$0xf] %vm93_vm6, %v91_v51  ;;  %v78_v53 = vmul.f32 %v76_v52, %v44_v24 }
 0x117   :  { %v84_v54 = vmul.f32 %v109_v41, %v78_v53 }
 0x119   :  { %v90_v55 = vadd.f32 %v110_v44, %v84_v54 }
 0x11b   :  { %v92_v56 = vpack.c.bf16 %v90_v55, %v90_v55 }
 0x11d   :  { %95 = vst.msk [vmem:[%s169_s4 + $0x4] sm:$0xf] %vm93_vm6, %v92_v56 }

// kernel: decoder_forward.24
= control target key start
LH: loop header
LB: loop body
LE: loop exit
PB: predicated region body
PF: predicated region fallthrough
CT: control target
= control target key end

     0   :  { %s650_s15 = smov 0   ;;  %s721_s0 = inlined_call_operand.vmem [shape: bf16[2,8,32], index: 0, kind: input, shape index: {}]   ;;  %s722_s1 = inlined_call_operand.vmem [shape: bf16[2,8,32], index: 1, kind: input, shape index: {}]   ;;  %s723_s2 = inlined_call_operand.vmem [shape: bf16[2,8,32], index: 2, kind: input, shape index: {}]   ;;  %s724_s3 = inlined_call_operand.vmem [shape: f32[8,8], index: 3, kind: input, shape index: {}]   ;;  %s725_s4 = inlined_call_operand.vmem [shape: bf16[2,8,32], index: 4, kind: output, shape index: {}]  }
   0x1 LB: > { %s562_s16 = sadd.s32 4294967295, %s617_s15   ;;  %p566_p0 = scmp.ge.s32.totalorder %s617_s15, 1  ;;  %s617_s15 = sphi %s650_s15, %s14_s15  }
   0x2   : > { %p179_p1 = scmp.lt.s32.totalorder %s617_s15, 3 }
   0x4   : > { %p180_p2 = pnand %p566_p0, %p179_p1 }
   0x5   : > { %p211_p3 = scmp.lt.s32.totalorder (!%p180_p2), %s562_s16, 1  ;;  %s619_s24 = smov (!%p180_p2), 112  }
   0x6   : > { %183 = sbr.rel (%p180_p2) target bundleno = 1080 (0x438), region = 36  ;;  %s620_s25 = smov (!%p180_p2), 104  }
   0x7   : > { %s621_s28 = smov (!%p180_p2), 120   ;;  %s622_s9 = smov (!%p180_p2), 8  }
   0x8   : > { %s623_s10 = smov (!%p180_p2), 16   ;;  %s624_s11 = smov (!%p180_p2), 24  }
   0xb   : > { %s727_s16 = smov (!%p211_p3, %s562_s16), 1  ;;  %vm232_vm0 = vcmask 64512   ;;  %v231_v7 = vld [vmem:[%s724_s3] sm:$0xff]  ;;  %vm267_vm1 = vcmask 1043456   ;;  %vm285_vm2 = vcmask 60416   ;;  %vm357_vm3 = vcmask 126016  }
   0xc   : > { %s658_s17 = sshll.u32 %s727_s16, 2  ;;  %vm420_vm4 = vcmask 191616   ;;  %vm483_vm5 = vcmask 257216  }
   0xd   : > { %s218_s20 = scalar_lea.vmem %s722_s1, %s658_s17  ;;  %s214_s23 = scalar_lea.vmem %s721_s0, %s658_s17 }
   0xe   : > { %v229_v0 = vld [vmem:[%s218_s20] sm:$0xf]  ;;  %s222_s5 = scalar_lea.vmem %s723_s2, %s658_s17  ;;  %s698_s8 = scalar_lea.vmem %s725_s4, %s658_s17 }
   0xf   : > { %v237_v1 = vsel %vm232_vm0, %v229_v0, 0  ;;  %v228_v2 = vld [vmem:[%s214_s23] sm:$0xf]  ;;  %v293_v3 = vunpack.c.l.b16 %v229_v0 }
  0x10   : > { %246 = vmatpush.bf16.xpose.msra.mxu0 %v237_v1  ;;  %v288_v5 = vunpack.c.l.b16 %v228_v2  ;;  %v230_v22 = vld [vmem:[%s222_s5] sm:$0xf] }
  0x11   : > { %v294_v4 = vpack.c.b16 %v293_v3, %v293_v3  ;;  %v269_v23 = vsel %vm267_vm1, %v230_v22, 0  ;;  %v329_v47 = vunpack.c.l.b16 %v230_v22 }
  0x12   : > { %v289_v6 = vpack.c.b16 %v288_v5, %v288_v5  ;;  %278 = vmatpush.bf16.msra.mxu1 %v269_v23 }
  0x13   : > { %361 = vrot.lane.b32.xlu2 %v294_v4, %s619_s24  ;;  %v330_v48 = vpack.c.b16 %v329_v47, %v329_v47 }
  0x17   : > { %571 = vmatmul.msk.bf16.vlgmr.msra.gmra.mxu0 %vm232_vm0, %v228_v2 }
  0x1b   : > { %424 = vrot.lane.b32.xlu2 %v294_v4, %s620_s25 }
  0x23   : > { %359 = vrot.lane.b32.xlu2 %v289_v6, %s619_s24 }
  0x2b   : > { %422 = vrot.lane.b32.xlu2 %v289_v6, %s620_s25 }
  0x6d   : > { %v362_v12 = vpop.permute.xlu2 %361 }
  0x6e   : > { %v367_v24 = vsel %vm232_vm0, %v362_v12, 0 }
  0x6f   : > { %376 = vmatpush.bf16.xpose.msrb.mxu1 %v367_v24 }
  0x75   : > { %v425_v13 = vpop.permute.xlu2 %424 }
  0x76   : > { %v430_v18 = vsel %vm232_vm0, %v425_v13, 0 }
  0x77   : > { %439 = vmatpush.bf16.xpose.msrb.mxu0 %v430_v18 }
  0x7d   : > { %v360_v17 = vpop.permute.xlu2 %359 }
  0x85   : > { %v423_v21 = vpop.permute.xlu2 %422 }
  0x86   : > { %577 = vmatmul.msk.bf16.vlgmr.msrb.gmra.mxu0 %vm232_vm0, %v423_v21 }
  0x94   : > { %v248_v8 = vpop.f32.mrf.mxu0 }
  0x95   : > { %v249_v9 = vadd.f32 %v248_v8, %v231_v7 }
  0x97   : > { %v252_v10 = vsel %vm232_vm0, %v249_v9, -inf }
  0x98   : > { %253 = vmax.xlane.f32.xlu0 %v252_v10 }
  0x9c   : > { %v250_v11 = vpop.f32.mrf.mxu0 }
  0xac   : > { %295 = vrot.lane.b32.xlu0 %v294_v4, %s621_s28 }
 0x103   : > { %v441_v31 = vpop.f32.mrf.mxu0 }
 0x104   : > { %v442_v32 = vadd.f32 %v441_v31, %v231_v7 }
 0x106   : > { %v445_v33 = vsel %vm232_vm0, %v442_v32, -inf }
 0x10b   : > { %v254_v14 = vpop.xlane.xlu0 %253  ;;  %v443_v34 = vpop.f32.mrf.mxu0 }
 0x10c   : > { %v255_v15 = vsub.f32 %v249_v9, %v254_v14 }
 0x10e   : > { %v256_v16 = vmul.f32 1.442695, %v255_v15 }
 0x110   : > { %595 = vpow2.f32 %v256_v16 }
 0x116   : > { %v596_v19 = vpop.eup %595 }
 0x117   : > { %v258_v20 = vsel %vm232_vm0, %v596_v19, 0.0 }
 0x118   : > { %259 = vadd.xlane.f32.xlu1 %v258_v20 }
 0x11e   : > { %v296_v25 = vpop.permute.xlu0 %295 }
 0x11f   : > { %v301_v26 = vsel %vm232_vm0, %v296_v25, 0 }
 0x120   : > { %310 = vmatpush.bf16.xpose.msra.mxu2 %v301_v26 }
 0x131   : > { %290 = vrot.lane.b32.xlu1 %v289_v6, %s621_s28 }
 0x15b   : > { %446 = vmax.xlane.f32.xlu1 %v445_v33 }
 0x18b   : > { %v260_v27 = vpop.xlane.xlu1 %259 }
 0x18c   : > { %597 = vrcp.f32 %v260_v27 }
 0x192   : > { %v598_v28 = vpop.eup %597 }
 0x193   : > { %v262_v29 = vmul.f32 %v598_v28, %v596_v19 }
 0x195   : > { %v263_v30 = vpack.c.bf16 %v262_v29, %v262_v29 }
 0x197   : > { %572 = vmatmul.msk.bf16.vlgmr.msra.gmra.mxu1 %vm232_vm0, %v263_v30 }
 0x1a3   : > { %v291_v35 = vpop.permute.xlu1 %290 }
 0x1a4   : > { %573 = vmatmul.msk.bf16.vlgmr.msra.gmra.mxu2 %vm232_vm0, %v291_v35 }
 0x1a7   : > { %575 = vmatmul.msk.bf16.vlgmr.msrb.gmra.mxu1 %vm232_vm0, %v360_v17 }
 0x1ce   : > { %v447_v51 = vpop.xlane.xlu1 %446 }
 0x1cf   : > { %v448_v55 = vsub.f32 %v442_v32, %v447_v51 }
 0x1d1   : > { %v449_v57 = vmul.f32 1.442695, %v448_v55 }
 0x214   : > { %v280_v36 = vpop.f32.mrf.mxu1 }
 0x215   : > { %v284_v37 = vpack.c.bf16 %v280_v36, %v280_v36 }
 0x217   : > { %286 = vst.msk [vmem:[%s698_s8] sm:$0xf] %vm285_vm2, %v284_v37 }
 0x21c   : > { %v282_v38 = vpop.f32.mrf.mxu1 }
 0x224   : > { %v378_v39 = vpop.f32.mrf.mxu1 }
 0x225   : > { %v379_v40 = vadd.f32 %v378_v39, %v231_v7 }
 0x227   : > { %v312_v41 = vpop.f32.mrf.mxu2  ;;  %v382_v42 = vsel %vm232_vm0, %v379_v40, -inf }
 0x228   : > { %v313_v43 = vadd.f32 %v312_v41, %v231_v7  ;;  %383 = vmax.xlane.f32.xlu2 %v382_v42 }
 0x22a   : > { %v316_v44 = vsel %vm232_vm0, %v313_v43, -inf }
 0x22b   : > { %317 = vmax.xlane.f32.xlu0 %v316_v44 }
 0x22c   : > { %v380_v45 = vpop.f32.mrf.mxu1 }
 0x22f   : > { %v314_v46 = vpop.f32.mrf.mxu2 }
 0x240   : > { %331 = vrot.lane.b32.xlu2 %v330_v48, %s621_s28 }
 0x29b   : > { %v384_v49 = vpop.xlane.xlu2 %383 }
 0x29c   : > { %v385_v50 = vsub.f32 %v379_v40, %v384_v49 }
 0x29e   : > { %v386_v52 = vmul.f32 1.442695, %v385_v50  ;;  %v318_v53 = vpop.xlane.xlu0 %317 }
 0x29f   : > { %v319_v54 = vsub.f32 %v313_v43, %v318_v53 }
 0x2a0   : > { %599 = vpow2.f32 %v386_v52 }
 0x2a1   : > { %v320_v56 = vmul.f32 1.442695, %v319_v54 }
 0x2a3   : > { %601 = vpow2.f32 %v320_v56  ;;  %v332_v0 = vpop.permute.xlu2 %331 }
 0x2a4   : > { %603 = vpow2.f32 %v449_v57  ;;  %v337_v1 = vsel %vm267_vm1, %v332_v0, 0 }
 0x2a5   : > { %346 = vmatpush.bf16.msra.mxu3 %v337_v1 }
 0x2a6   : > { %v600_v58 = vpop.eup %599 }
 0x2a7   : > { %v388_v59 = vsel %vm232_vm0, %v600_v58, 0.0 }
 0x2a8   : > { %389 = vadd.xlane.f32.xlu1 %v388_v59 }
 0x2a9   : > { %v602_v60 = vpop.eup %601 }
 0x2aa   : > { %v322_v61 = vsel %vm232_vm0, %v602_v60, 0.0  ;;  %v604_v62 = vpop.eup %603 }
 0x2ab   : > { %323 = vadd.xlane.f32.xlu0 %v322_v61  ;;  %v451_v63 = vsel %vm232_vm0, %v604_v62, 0.0 }
 0x2b3   : > { %452 = vadd.xlane.f32.xlu0 %v451_v63 }
 0x2c1   : > { %394 = vrot.lane.b32.xlu1 %v330_v48, %s619_s24 }
 0x2c7   : > { %457 = vrot.lane.b32.xlu0 %v330_v48, %s620_s25 }
 0x31b   : > { %v390_v5 = vpop.xlane.xlu1 %389 }
 0x31e   : > { %v324_v2 = vpop.xlane.xlu0 %323 }
 0x31f   : > { %605 = vrcp.f32 %v324_v2 }
 0x320   : > { %607 = vrcp.f32 %v390_v5 }
 0x325   : > { %v606_v3 = vpop.eup %605 }
 0x326   : > { %v326_v4 = vmul.f32 %v606_v3, %v602_v60  ;;  %v453_v7 = vpop.xlane.xlu0 %452  ;;  %v608_v8 = vpop.eup %607 }
 0x327   : > { %609 = vrcp.f32 %v453_v7  ;;  %v392_v10 = vmul.f32 %v608_v8, %v600_v58 }
 0x328   : > { %v327_v6 = vpack.c.bf16 %v326_v4, %v326_v4 }
 0x329   : > { %v393_v14 = vpack.c.bf16 %v392_v10, %v392_v10 }
 0x32a   : > { %574 = vmatmul.msk.bf16.vlgmr.msra.gmra.mxu3 %vm232_vm0, %v327_v6 }
 0x32d   : > { %v610_v12 = vpop.eup %609 }
 0x32e   : > { %v455_v13 = vmul.f32 %v610_v12, %v604_v62 }
 0x330   : > { %v456_v17 = vpack.c.bf16 %v455_v13, %v455_v13 }
 0x333   : > { %v395_v9 = vpop.permute.xlu1 %394 }
 0x334   : > { %v400_v11 = vsel %vm267_vm1, %v395_v9, 0 }
 0x335   : > { %409 = vmatpush.bf16.msrb.mxu3 %v400_v11 }
 0x339   : > { %v458_v15 = vpop.permute.xlu0 %457 }
 0x33a   : > { %576 = vmatmul.msk.bf16.vlgmr.msrb.gmra.mxu3 %vm232_vm0, %v393_v14  ;;  %v463_v16 = vsel %vm267_vm1, %v458_v15, 0 }
 0x33b   : > { %472 = vmatpush.bf16.msrb.mxu2 %v463_v16 }
 0x33e   : > { %578 = vmatmul.msk.bf16.vlgmr.msrb.gmra.mxu2 %vm232_vm0, %v456_v17 }
 0x3ad   : > { %v348_v18 = vpop.f32.mrf.mxu3 }
 0x3ae   : > { %v352_v19 = vpack.c.bf16 %v348_v18, %v348_v18 }
 0x3b0   : > { %354 = vrot.lane.b32.xlu2 %v352_v19, %s622_s9 }
 0x3b5   : > { %v350_v20 = vpop.f32.mrf.mxu3 }
 0x3bd   : > { %v411_v21 = vpop.f32.mrf.mxu3 }
 0x3be   : > { %v415_v22 = vpack.c.bf16 %v411_v21, %v411_v21 }
 0x3c0   : > { %417 = vrot.lane.b32.xlu2 %v415_v22, %s623_s10 }
 0x3c1   : > { %v474_v23 = vpop.f32.mrf.mxu2 }
 0x3c2   : > { %v478_v24 = vpack.c.bf16 %v474_v23, %v474_v23 }
 0x3c4   : > { %480 = vrot.lane.b32.xlu0 %v478_v24, %s624_s11 }
 0x3c5   : > { %v413_v25 = vpop.f32.mrf.mxu3 }
 0x3c9   : > { %v476_v26 = vpop.f32.mrf.mxu2 }
 0x40a   : > { %v355_v27 = vpop.permute.xlu2 %354 }
 0x40b   : > { %358 = vst.msk [vmem:[%s698_s8] sm:$0xf] %vm357_vm3, %v355_v27 }
 0x41a   : > { %v418_v28 = vpop.permute.xlu2 %417 }
 0x41b   : > { %421 = vst.msk [vmem:[%s698_s8] sm:$0xf] %vm420_vm4, %v418_v28 }
 0x436   : > { %v481_v29 = vpop.permute.xlu0 %480 }
 0x437   : > { %484 = vst.msk [vmem:[%s698_s8] sm:$0xf] %vm483_vm5, %v481_v29 }
 0x438 PF: > { %s14_s15 = sadd.s32 1, %s617_s15  }
 0x439   : > { %p11_p4 = scmp.ge.s32.totalorder %s14_s15, 4  }
 0x43b   :  { %13 = sbr.rel (!%p11_p4) target bundleno = 1 (0x1), region = 72 }

// kernel: decoder_forward.32
= control target key start
LH: loop header
LB: loop body
LE: loop exit
PB: predicated region body
PF: predicated region fallthrough
CT: control target
= control target key end

     0   :  { %10 = vsyncpa [#allocation3], 0  ;;  %s337_s21 = smov [#allocation2]   ;;  %s428_s0 = inlined_call_operand.vmem [shape: bf16[16,128], index: 0, kind: input, shape index: {}]   ;;  %s429_s1 = inlined_call_operand.vmem [shape: bf16[128,128], index: 1, kind: input, shape index: {}]   ;;  %s430_s2 = inlined_call_operand.vmem [shape: f32[1,128], index: 2, kind: input, shape index: {}]   ;;  %s431_s3 = inlined_call_operand.vmem [shape: bf16[128,128], index: 3, kind: input, shape index: {}]   ;;  %s432_s4 = inlined_call_operand.hbm [shape: f32[1,128], index: 4, kind: input, shape index: {}]   ;;  %s433_s5 = inlined_call_operand.vmem [shape: bf16[16,128], index: 5, kind: output, shape index: {}]  }
   0x1   :  { %s24_s20 = sshll.u32 %s432_s4, 4  ;;  %s26_s22 = sshll.u32 %s337_s21, 4  ;;  %s25_s20 = int_to_ptr.hbm [resolvable:$true] %s24_s20  ;;  %s27_s22 = int_to_ptr.vmem [resolvable:$true] %s26_s22 }
   0x2   :  { %29 = dma.hbm_to_vmem [thread:$0]  %s25_s20, 16, %s27_s22, [#allocation3]  }
   0x3   :  { %335 = dma.done.wait [#allocation3], 16  }
   0x4   :  { %336 = vsyncadd [#allocation3], 4294967280  ;;  %v294_v0 = vld [vmem:[%s429_s1 + $0x38] sm:$0xff]  ;;  %v293_v1 = vld [vmem:[%s429_s1 + $0x30] sm:$0xff] }
   0x5   :  { %110 = vmatpush.bf16.msra.mxu0 %v294_v0  ;;  %v302_v2 = vld [vmem:[%s431_s3 + $0x38] sm:$0xff]  ;;  %v301_v3 = vld [vmem:[%s431_s3 + $0x30] sm:$0xff]  ;;  %v292_v4 = vld [vmem:[%s429_s1 + $0x28] sm:$0xff] }
   0x6   :  { %195 = vmatpush.bf16.msra.mxu1 %v302_v2  ;;  %v300_v5 = vld [vmem:[%s431_s3 + $0x28] sm:$0xff]  ;;  %v291_v6 = vld [vmem:[%s429_s1 + $0x20] sm:$0xff]  ;;  %v290_v8 = vld [vmem:[%s429_s1 + $0x18] sm:$0xff] }
   0x7   :  { %v299_v7 = vld [vmem:[%s431_s3 + $0x20] sm:$0xff]  ;;  %v289_v9 = vld [vmem:[%s429_s1 + $0x10] sm:$0xff]  ;;  %v288_v10 = vld [vmem:[%s429_s1 + $0x8] sm:$0xff] }
   0x8   :  { %v287_v11 = vld [vmem:[%s429_s1] sm:$0xff]  ;;  %v298_v13 = vld [vmem:[%s431_s3 + $0x18] sm:$0xff]  ;;  %v297_v14 = vld [vmem:[%s431_s3 + $0x10] sm:$0xff] }
   0x9   :  { %111 = vmatpush.bf16.msra.mxu0 %v293_v1  ;;  %v286_v12 = vld [vmem:[%s428_s0] sm:$0xff]  ;;  %v296_v15 = vld [vmem:[%s431_s3 + $0x8] sm:$0xff] }
   0xa   :  { %196 = vmatpush.bf16.msra.mxu1 %v301_v3  ;;  %v295_v16 = vld [vmem:[%s431_s3] sm:$0xff] }
   0xb   :  { %v309_v18 = vld [vmem:[%s430_s2] ss:$0 sm:$0xff] }
   0xc   :  { %v310_v26 = vld [vmem:[#allocation2] ss:$0 sm:$0xff] }
   0xd   :  { %112 = vmatpush.bf16.msra.mxu0 %v292_v4 }
   0xe   :  { %197 = vmatpush.bf16.msra.mxu1 %v300_v5 }
  0x11   :  { %113 = vmatpush.bf16.msra.mxu0 %v291_v6 }
  0x12   :  { %198 = vmatpush.bf16.msra.mxu1 %v299_v7 }
  0x15   :  { %114 = vmatpush.bf16.msra.mxu0 %v290_v8 }
  0x16   :  { %199 = vmatpush.bf16.msra.mxu1 %v298_v13 }
  0x19   :  { %115 = vmatpush.bf16.msra.mxu0 %v289_v9 }
  0x1a   :  { %200 = vmatpush.bf16.msra.mxu1 %v297_v14 }
  0x1d   :  { %116 = vmatpush.bf16.msra.mxu0 %v288_v10 }
  0x1e   :  { %201 = vmatpush.bf16.msra.mxu1 %v296_v15 }
  0x21   :  { %117 = vmatpush.bf16.msra.mxu0 %v287_v11 }
  0x22   :  { %202 = vmatpush.bf16.msra.mxu1 %v295_v16 }
  0x24   :  { %118 = vmatmul.bf16.vlgmr.msra.gmra.mxu0 %v286_v12 }
  0xa1   :  { %v119_v17 = vpop.f32.mrf.mxu0 }
  0xa2   :  { %v120_v19 = vadd.f32 %v309_v18, %v119_v17 }
  0xa4   :  { %v124_v22 = vmax.f32 %v120_v19, 0.0 }
  0xa9   :  { %v121_v20 = vpop.f32.mrf.mxu0 }
  0xaa   :  { %v122_v21 = vadd.f32 %v309_v18, %v121_v20 }
  0xac   :  { %v125_v23 = vmax.f32 %v122_v21, 0.0 }
  0xae   :  { %v126_v24 = vpack.c.bf16 %v125_v23, %v124_v22 }
  0xb0   :  { %203 = vmatmul.bf16.vlgmr.msra.gmra.mxu1 %v126_v24 }
 0x12d   :  { %v204_v25 = vpop.f32.mrf.mxu1 }
 0x12e   :  { %v205_v28 = vadd.f32 %v310_v26, %v204_v25 }
 0x135   :  { %v206_v27 = vpop.f32.mrf.mxu1 }
 0x136   :  { %v207_v29 = vadd.f32 %v310_v26, %v206_v27 }
 0x138   :  { %v306_v30 = vpack.c.bf16 %v207_v29, %v205_v28 }
 0x13a   :  { %307 = vst [vmem:[%s433_s5] sm:$0xff] %v306_v30  }
 0x13b   :  { %217 = vsyncpa [#allocation3], 1 }

// kernel: decoder_forward.43
= control target key start
LH: loop header
LB: loop body
LE: loop exit
PB: predicated region body
PF: predicated region fallthrough
CT: control target
= control target key end

     0   :  { %10 = vsyncpa [#allocation3], 0  ;;  %s437_s0 = inlined_call_operand.vmem [shape: bf16[16,128], index: 0, kind: input, shape index: {}]   ;;  %s438_s1 = inlined_call_operand.hbm [shape: bf16[128,128], index: 1, kind: input, shape index: {}]   ;;  %s439_s2 = inlined_call_operand.vmem [shape: f32[1,128], index: 2, kind: input, shape index: {}]   ;;  %s440_s3 = inlined_call_operand.hbm [shape: bf16[128,128], index: 3, kind: input, shape index: {}]   ;;  %s441_s4 = inlined_call_operand.vmem [shape: f32[1,128], index: 4, kind: input, shape index: {}]   ;;  %s442_s5 = inlined_call_operand.vmem [shape: bf16[16,128], index: 5, kind: output, shape index: {}]  }
   0x1   :  { %s18_s20 = sshll.u32 %s438_s1, 4  ;;  %s19_s20 = int_to_ptr.hbm [resolvable:$true] %s18_s20 }
   0x2   :  { %11 = vsyncpa [#allocation5], 0  ;;  %s385_s21 = smov [#allocation2]   ;;  %s33_s25 = sshll.u32 %s440_s3, 4  ;;  %s34_s25 = int_to_ptr.hbm [resolvable:$true] %s33_s25 }
   0x3   :  { %s20_s22 = sshll.u32 %s385_s21, 4  ;;  %s386_s26 = smov 64   ;;  %s21_s22 = int_to_ptr.vmem [resolvable:$true] %s20_s22 }
   0x4   :  { %s387_s27 = smov 4   ;;  %s388_s28 = smov [#allocation4]  }
   0x5   :  { %26 = dma.hbm_to_vmem [thread:$0]  %s19_s20, 1024, %s21_s22, [#allocation3], %s386_s26, %s386_s26, %s387_s27  }
   0x6   :  { %s35_s29 = sshll.u32 %s388_s28, 4  ;;  %s36_s29 = int_to_ptr.vmem [resolvable:$true] %s35_s29 }
   0x7   :  { %41 = dma.hbm_to_vmem [thread:$0]  %s34_s25, 1024, %s36_s29, [#allocation5], %s386_s26, %s386_s26, %s387_s27  }
   0x8   :  { %381 = dma.done.wait [#allocation3], 1024  }
   0x9   :  { %382 = vsyncadd [#allocation3], 4294966272 }
   0xa   :  { %383 = dma.done.wait [#allocation5], 1024  }
   0xb   :  { %384 = vsyncadd [#allocation5], 4294966272  ;;  %v313_v0 = vld [vmem:[#allocation2 + $0x38] sm:$0xff]  ;;  %v312_v1 = vld [vmem:[#allocation2 + $0x30] sm:$0xff] }
   0xc   :  { %128 = vmatpush.bf16.msra.mxu0 %v313_v0  ;;  %v321_v2 = vld [vmem:[#allocation4 + $0x38] sm:$0xff]  ;;  %v320_v3 = vld [vmem:[#allocation4 + $0x30] sm:$0xff]  ;;  %v311_v4 = vld [vmem:[#allocation2 + $0x28] sm:$0xff] }
   0xd   :  { %213 = vmatpush.bf16.msra.mxu1 %v321_v2  ;;  %v319_v5 = vld [vmem:[#allocation4 + $0x28] sm:$0xff]  ;;  %v310_v6 = vld [vmem:[#allocation2 + $0x20] sm:$0xff]  ;;  %v309_v8 = vld [vmem:[#allocation2 + $0x18] sm:$0xff] }
   0xe   :  { %v318_v7 = vld [vmem:[#allocation4 + $0x20] sm:$0xff]  ;;  %v308_v9 = vld [vmem:[#allocation2 + $0x10] sm:$0xff]  ;;  %v307_v10 = vld [vmem:[#allocation2 + $0x8] sm:$0xff] }
   0xf   :  { %v306_v11 = vld [vmem:[#allocation2] sm:$0xff]  ;;  %v317_v13 = vld [vmem:[#allocation4 + $0x18] sm:$0xff]  ;;  %v316_v14 = vld [vmem:[#allocation4 + $0x10] sm:$0xff] }
  0x10   :  { %129 = vmatpush.bf16.msra.mxu0 %v312_v1  ;;  %v305_v12 = vld [vmem:[%s437_s0] sm:$0xff]  ;;  %v315_v15 = vld [vmem:[#allocation4 + $0x8] sm:$0xff] }
  0x11   :  { %214 = vmatpush.bf16.msra.mxu1 %v320_v3  ;;  %v314_v16 = vld [vmem:[#allocation4] sm:$0xff] }
  0x12   :  { %v331_v18 = vld [vmem:[%s439_s2] ss:$0 sm:$0xff] }
  0x13   :  { %v332_v26 = vld [vmem:[%s441_s4] ss:$0 sm:$0xff] }
  0x14   :  { %130 = vmatpush.bf16.msra.mxu0 %v311_v4 }
  0x15   :  { %215 = vmatpush.bf16.msra.mxu1 %v319_v5 }
  0x18   :  { %131 = vmatpush.bf16.msra.mxu0 %v310_v6 }
  0x19   :  { %216 = vmatpush.bf16.msra.mxu1 %v318_v7 }
  0x1c   :  { %132 = vmatpush.bf16.msra.mxu0 %v309_v8 }
  0x1d   :  { %217 = vmatpush.bf16.msra.mxu1 %v317_v13 }
  0x20   :  { %133 = vmatpush.bf16.msra.mxu0 %v308_v9 }
  0x21   :  { %218 = vmatpush.bf16.msra.mxu1 %v316_v14 }
  0x24   :  { %134 = vmatpush.bf16.msra.mxu0 %v307_v10 }
  0x25   :  { %219 = vmatpush.bf16.msra.mxu1 %v315_v15 }
  0x28   :  { %135 = vmatpush.bf16.msra.mxu0 %v306_v11 }
  0x29   :  { %220 = vmatpush.bf16.msra.mxu1 %v314_v16 }
  0x2b   :  { %136 = vmatmul.bf16.vlgmr.msra.gmra.mxu0 %v305_v12 }
  0xa8   :  { %v137_v17 = vpop.f32.mrf.mxu0 }
  0xa9   :  { %v138_v19 = vadd.f32 %v331_v18, %v137_v17 }
  0xab   :  { %v142_v22 = vmax.f32 %v138_v19, 0.0 }
  0xb0   :  { %v139_v20 = vpop.f32.mrf.mxu0 }
  0xb1   :  { %v140_v21 = vadd.f32 %v331_v18, %v139_v20 }
  0xb3   :  { %v143_v23 = vmax.f32 %v140_v21, 0.0 }
  0xb5   :  { %v144_v24 = vpack.c.bf16 %v143_v23, %v142_v22 }
  0xb7   :  { %221 = vmatmul.bf16.vlgmr.msra.gmra.mxu1 %v144_v24 }
 0x134   :  { %v222_v25 = vpop.f32.mrf.mxu1 }
 0x135   :  { %v223_v28 = vadd.f32 %v332_v26, %v222_v25 }
 0x13c   :  { %v224_v27 = vpop.f32.mrf.mxu1 }
 0x13d   :  { %v225_v29 = vadd.f32 %v332_v26, %v224_v27 }
 0x13f   :  { %v325_v30 = vpack.c.bf16 %v225_v29, %v223_v28 }
 0x141   :  { %326 = vst [vmem:[%s442_s5] sm:$0xff] %v325_v30  }
 0x142   :  { %235 = vsyncpa [#allocation3], 1 }
 0x143   :  { %236 = vsyncpa [#allocation5], 1 }

// kernel: decoder_forward.40
= control target key start
LH: loop header
LB: loop body
LE: loop exit
PB: predicated region body
PF: predicated region fallthrough
CT: control target
= control target key end

     0   :  { %11 = vsyncpa [#allocation3], 0  ;;  %s1081_s0 = inlined_call_operand.vmem [shape: bf16[2,8,32], index: 0, kind: input, shape index: {}]   ;;  %s1082_s1 = inlined_call_operand.vmem [shape: bf16[2,8,32], index: 1, kind: input, shape index: {}]   ;;  %s1083_s2 = inlined_call_operand.vmem [shape: bf16[2,8,32], index: 2, kind: input, shape index: {}]   ;;  %s1084_s3 = inlined_call_operand.vmem [shape: f32[8,8], index: 3, kind: input, shape index: {}]   ;;  %s1085_s4 = inlined_call_operand.vmem [shape: bf16[2,8,32], index: 4, kind: output, shape index: {0}]   ;;  %s1086_s5 = inlined_call_operand.hbm [shape: f32[2,4,8,8], index: 5, kind: output, shape index: {1}]  }
   0x1   :  { %13 = vsyncpa [#allocation3 + $0x1], 0  ;;  %s904_s18 = smov 0   ;;  %s906_s19 = smov 0  }
   0x2   :  { %s908_s20 = smov 0   ;;  %s910_s21 = smov 0  }
   0x3 LB: > { %s925_s22 = sadd.s32 4294967295, %s865_s21   ;;  %s715_s23 = sadd.s32 4294967294, %s865_s21   ;;  %s865_s21 = sphi %s910_s21, %s1092_s21   ;;  %s861_s20 = sphi %s908_s20, %s1091_s20   ;;  %s857_s19 = sphi %s906_s19, %s1090_s19   ;;  %s853_s18 = sphi %s904_s18, %s1089_s18  }
   0x4   : > { %s929_s24 = sadd.s32 1, %s865_s21   ;;  %s151_s25 = sadd.s32 1, %s861_s20 }
   0x5   : > { %s148_s26 = ssub.s32 %s865_s21, %s929_s24  ;;  %p161_p0 = scmp.ne.s32.totalorder %s861_s20, %s857_s19 }
   0x6   : > { %p149_p1 = scmp.eq.s32.totalorder %s148_s26, 0  ;;  %p162_p2 = scmp.eq.s32.totalorder %s925_s22, 1 }
   0x7   : > { %p167_p3 = scmp.ne.s32.totalorder %s857_s19, %s853_s18  ;;  %p168_p4 = scmp.eq.s32.totalorder %s715_s23, 1 }
   0x8   : > { %s940_s27 = scalar_select %p149_p1, %s861_s20, %s151_s25  }
   0x9   : > { %p942_p5 = por %p162_p2, %p161_p0  ;;  %p946_p6 = por %p168_p4, %p167_p3 }
   0xa   : > { %p718_p7 = scmp.ge.s32.totalorder %s865_s21, 1  ;;  %p210_p8 = scmp.lt.s32.totalorder %s865_s21, 3 }
   0xc   : > { %p211_p9 = pnand %p718_p7, %p210_p8 }
   0xd   : > { %p249_p10 = scmp.lt.s32.totalorder (!%p211_p9), %s925_s22, 1  ;;  %s867_s13 = smov (!%p211_p9), 120  }
   0xe   : > { %214 = sbr.rel (%p211_p9) target bundleno = 1094 (0x446), region = 36  ;;  %s868_s14 = smov (!%p211_p9), 112  }
   0xf   : > { %s869_s15 = smov (!%p211_p9), 104   ;;  %s823_s10 = scalar_lea.hbm (!%p211_p9), %s1086_s5, 64 }
  0x13   : > { %s250_s30 = scalar_select %p249_p10, %s925_s22, 1  ;;  %vm270_vm0 = vcmask 64512   ;;  %v976_v10 = vld [vmem:[%s1084_s3] sm:$0xff]  ;;  %vm319_vm1 = vcmask 1043456   ;;  %vm337_vm10 = vcmask 60416  }
  0x15   : > { %s954_s6 = sshll.u32 %s250_s30, 2  ;;  %s246_s30 = sand.u32 1, %s857_s19  }
  0x16   : > { %s256_s9 = scalar_lea.vmem %s1082_s1, %s954_s6  ;;  %s252_s12 = scalar_lea.vmem %s1081_s0, %s954_s6 }
  0x17   : > { %v267_v0 = vld [vmem:[%s256_s9] sm:$0xf]  ;;  %s260_s26 = scalar_lea.vmem %s1083_s2, %s954_s6  ;;  %s719_s7 = sshll.u32 %s246_s30, 5 }
  0x18   : > { %v275_v1 = vsel %vm270_vm0, %v267_v0, 0  ;;  %v345_v2 = vunpack.c.l.b16 %v267_v0  ;;  %v266_v4 = vld [vmem:[%s252_s12] sm:$0xf]  ;;  %s1005_s8 = scalar_lea.vmem [#allocation2], %s719_s7  ;;  %s1020_s11 = scalar_lea.vmem %s1085_s4, %s954_s6 }
  0x19   : > { %284 = vmatpush.bf16.xpose.msra.mxu0 %v275_v1  ;;  %v340_v5 = vunpack.c.l.b16 %v266_v4  ;;  %v268_v28 = vld [vmem:[%s260_s26] sm:$0xf]  ;;  %s870_s6 = smov 24   ;;  %s871_s12 = smov 8  }
  0x1a   : > { %v346_v3 = vpack.c.b16 %v345_v2, %v345_v2  ;;  %v321_v30 = vsel %vm319_vm1, %v268_v28, 0  ;;  %v396_v45 = vunpack.c.l.b16 %v268_v28  ;;  %s602_s17 = sshll.u32 %s1005_s8, 4  ;;  %s587_s25 = scalar_lea.sflag [#allocation3], %s246_s30  ;;  %s603_s17 = int_to_ptr.vmem [resolvable:$true] %s602_s17 }
  0x1b   : > { %v341_v6 = vpack.c.b16 %v340_v5, %v340_v5  ;;  %330 = vmatpush.bf16.msra.mxu1 %v321_v30 }
  0x1c   : > { %347 = vrot.lane.b32.xlu1 %v346_v3, %s867_s13  ;;  %428 = vrot.lane.b32.xlu2 %v346_v3, %s868_s14  ;;  %v1001_v50 = vpack.c.b16 %v396_v45, %v396_v45 }
  0x20   : > { %724 = vmatmul.msk.bf16.vlgmr.msra.gmra.mxu0 %vm270_vm0, %v266_v4 }
  0x24   : > { %342 = vrot.lane.b32.xlu1 %v341_v6, %s867_s13  ;;  %506 = vrot.lane.b32.xlu2 %v346_v3, %s869_s15 }
  0x2c   : > { %504 = vrot.lane.b32.xlu1 %v341_v6, %s869_s15 }
  0x76   : > { %v429_v15 = vpop.permute.xlu2 %428 }
  0x77   : > { %v434_v29 = vsel %vm270_vm0, %v429_v15, 0 }
  0x78   : > { %443 = vmatpush.bf16.xpose.msrb.mxu1 %v434_v29 }
  0x7e   : > { %v507_v16 = vpop.permute.xlu2 %506 }
  0x7f   : > { %v512_v17 = vsel %vm270_vm0, %v507_v16, 0 }
  0x80   : > { %521 = vmatpush.bf16.xpose.msrb.mxu0 %v512_v17 }
  0x8e   : > { %v348_v7 = vpop.permute.xlu1 %347 }
  0x8f   : > { %v353_v8 = vsel %vm270_vm0, %v348_v7, 0 }
  0x90   : > { %362 = vmatpush.bf16.xpose.msra.mxu2 %v353_v8 }
  0x96   : > { %v343_v9 = vpop.permute.xlu1 %342 }
  0x97   : > { %726 = vmatmul.msk.bf16.vlgmr.msra.gmra.mxu2 %vm270_vm0, %v343_v9 }
  0x9d   : > { %v286_v11 = vpop.f32.mrf.mxu0 }
  0x9e   : > { %v287_v12 = vadd.f32 %v286_v11, %v976_v10  ;;  %v505_v18 = vpop.permute.xlu1 %504 }
  0x9f   : > { %732 = vmatmul.msk.bf16.vlgmr.msrb.gmra.mxu0 %vm270_vm0, %v505_v18 }
  0xa0   : > { %v290_v13 = vsel %vm270_vm0, %v287_v12, -inf }
  0xa1   : > { %291 = vmax.xlane.f32.xlu0 %v290_v13 }
  0xa5   : > { %v288_v14 = vpop.f32.mrf.mxu0 }
 0x114   : > { %v292_v19 = vpop.xlane.xlu0 %291 }
 0x115   : > { %v293_v20 = vsub.f32 %v287_v12, %v292_v19 }
 0x117   : > { %v294_v21 = vmul.f32 1.442695, %v293_v20 }
 0x119   : > { %787 = vpow2.f32 %v294_v21 }
 0x11a   : > { %v364_v22 = vpop.f32.mrf.mxu2 }
 0x11b   : > { %v365_v23 = vadd.f32 %v364_v22, %v976_v10 }
 0x11c   : > { %v523_v31 = vpop.f32.mrf.mxu0 }
 0x11d   : > { %v368_v24 = vsel %vm270_vm0, %v365_v23, -inf  ;;  %v993_v32 = vadd.f32 %v523_v31, %v976_v10 }
 0x11e   : > { %369 = vmax.xlane.f32.xlu2 %v368_v24 }
 0x11f   : > { %v788_v25 = vpop.eup %787  ;;  %v527_v35 = vsel %vm270_vm0, %v993_v32, -inf }
 0x120   : > { %v296_v26 = vsel %vm270_vm0, %v788_v25, 0.0 }
 0x121   : > { %297 = vadd.xlane.f32.xlu0 %v296_v26 }
 0x122   : > { %v366_v27 = vpop.f32.mrf.mxu2 }
 0x124   : > { %v525_v38 = vpop.f32.mrf.mxu0 }
 0x135   : > { %426 = vrot.lane.b32.xlu0 %v341_v6, %s868_s14 }
 0x15f   : > { %528 = vmax.xlane.f32.xlu0 %v527_v35 }
 0x173   : > { %554 = vrot.lane.b32.xlu0 %v1001_v50, %s869_s15 }
 0x191   : > { %v370_v33 = vpop.xlane.xlu2 %369 }
 0x192   : > { %v371_v34 = vsub.f32 %v365_v23, %v370_v33 }
 0x194   : > { %v298_v36 = vpop.xlane.xlu0 %297  ;;  %v372_v37 = vmul.f32 1.442695, %v371_v34 }
 0x195   : > { %789 = vrcp.f32 %v298_v36  ;;  %v310_v44 = vand.u32 2147483648, %v298_v36  ;;  %v308_v47 = vand.u32 2147483647, %v298_v36  ;;  %vm304_vm3 = vweird.f32 %v298_v36 }
 0x196   : > { %791 = vpow2.f32 %v372_v37 }
 0x197   : > { %v311_v49 = vor.u32 1.1754944e-38, %v310_v44  ;;  %vm309_vm5 = vcmp.eq.f32.partialorder %v308_v47, 8.507059e+37 }
 0x19b   : > { %v790_v39 = vpop.eup %789 }
 0x19c   : > { %v792_v40 = vpop.eup %791  ;;  %v300_v41 = vmul.f32 %v790_v39, %v298_v36  ;;  %vm305_vm2 = vweird.f32 %v790_v39 }
 0x19d   : > { %v374_v42 = vsel %vm270_vm0, %v792_v40, 0.0  ;;  %vm306_vm4 = vmor %vm304_vm3, %vm305_vm2 }
 0x19e   : > { %v301_v43 = vsub.f32 1.0, %v300_v41  ;;  %375 = vadd.xlane.f32.xlu2 %v374_v42 }
 0x1a0   : > { %v302_v46 = vmul.f32 %v790_v39, %v301_v43 }
 0x1a2   : > { %v303_v48 = vadd.f32 %v790_v39, %v302_v46 }
 0x1a4   : > { %v307_v51 = vsel %vm306_vm4, %v790_v39, %v303_v48 }
 0x1a5   : > { %v312_v52 = vsel %vm309_vm5, %v311_v49, %v307_v51 }
 0x1a6   : > { %v313_v53 = vmul.f32 %v788_v25, %v312_v52 }
 0x1a7   : > { %v427_v55 = vpop.permute.xlu0 %426 }
 0x1a8   : > { %314 = vst.msk [vmem:[%s1005_s8] sm:$0xff] %vm270_vm0, %v313_v53  ;;  %v315_v54 = vpack.c.bf16 %v313_v53, %v313_v53 }
 0x1aa   : > { %725 = vmatmul.msk.bf16.vlgmr.msra.gmra.mxu1 %vm270_vm0, %v315_v54 }
 0x1ba   : > { %729 = vmatmul.msk.bf16.vlgmr.msrb.gmra.mxu1 %vm270_vm0, %v427_v55 }
 0x1d2   : > { %v529_v6 = vpop.xlane.xlu0 %528 }
 0x1d3   : > { %v530_v7 = vsub.f32 %v993_v32, %v529_v6 }
 0x1d5   : > { %v531_v9 = vmul.f32 1.442695, %v530_v7 }
 0x1e5   : > { %v555_v17 = vpop.permute.xlu0 %554 }
 0x1e6   : > { %v560_v18 = vsel %vm319_vm1, %v555_v17, 0 }
 0x1e7   : > { %569 = vmatpush.bf16.msrb.mxu2 %v560_v18 }
 0x211   : > { %v376_v56 = vpop.xlane.xlu2 %375 }
 0x212   : > { %793 = vrcp.f32 %v376_v56  ;;  %v388_v59 = vand.u32 2147483648, %v376_v56  ;;  %vm382_vm6 = vweird.f32 %v376_v56  ;;  %v386_v61 = vand.u32 2147483647, %v376_v56 }
 0x213   : > { %795 = vpow2.f32 %v531_v9 }
 0x214   : > { %v389_v63 = vor.u32 1.1754944e-38, %v388_v59  ;;  %vm387_vm9 = vcmp.eq.f32.partialorder %v386_v61, 8.507059e+37 }
 0x218   : > { %v794_v57 = vpop.eup %793 }
 0x219   : > { %v378_v58 = vmul.f32 %v794_v57, %v376_v56  ;;  %vm383_vm7 = vweird.f32 %v794_v57  ;;  %v796_v14 = vpop.eup %795 }
 0x21a   : > { %vm384_vm8 = vmor %vm382_vm6, %vm383_vm7  ;;  %v533_v16 = vsel %vm270_vm0, %v796_v14, 0.0 }
 0x21b   : > { %v379_v60 = vsub.f32 1.0, %v378_v58 }
 0x21d   : > { %v380_v62 = vmul.f32 %v794_v57, %v379_v60 }
 0x21f   : > { %v381_v0 = vadd.f32 %v794_v57, %v380_v62 }
 0x221   : > { %v385_v1 = vsel %vm384_vm8, %v794_v57, %v381_v0 }
 0x222   : > { %v390_v2 = vsel %vm387_vm9, %v389_v63, %v385_v1 }
 0x223   : > { %v1011_v3 = vmul.f32 %v792_v40, %v390_v2 }
 0x225   : > { %727 = vst.msk [vmem:[%s1005_s8 + $0x8] sm:$0xff] %vm270_vm0, %v1011_v3  ;;  %v394_v45 = vpack.c.bf16 %v1011_v3, %v1011_v3 }
 0x227   : > { %v332_v4 = vpop.f32.mrf.mxu1 }
 0x228   : > { %v336_v5 = vpack.c.bf16 %v332_v4, %v332_v4 }
 0x22a   : > { %338 = vst.msk [vmem:[%s1020_s11] sm:$0xf] %vm337_vm10, %v336_v5 }
 0x22f   : > { %v334_v8 = vpop.f32.mrf.mxu1 }
 0x237   : > { %v445_v11 = vpop.f32.mrf.mxu1 }
 0x238   : > { %v446_v12 = vadd.f32 %v445_v11, %v976_v10 }
 0x23a   : > { %v449_v13 = vsel %vm270_vm0, %v446_v12, -inf }
 0x23b   : > { %450 = vmax.xlane.f32.xlu1 %v449_v13 }
 0x23f   : > { %v447_v15 = vpop.f32.mrf.mxu1 }
 0x243   : > { %534 = vadd.xlane.f32.xlu1 %v533_v16 }
 0x25c   : > { %476 = vrot.lane.b32.xlu1 %v1001_v50, %s868_s14 }
 0x2ae   : > { %v451_v19 = vpop.xlane.xlu1 %450 }
 0x2af   : > { %v452_v20 = vsub.f32 %v446_v12, %v451_v19 }
 0x2b1   : > { %v453_v21 = vmul.f32 1.442695, %v452_v20 }
 0x2b3   : > { %797 = vpow2.f32 %v453_v21 }
 0x2b6   : > { %v535_v10 = vpop.xlane.xlu1 %534 }
 0x2b7   : > { %799 = vrcp.f32 %v535_v10  ;;  %v547_v27 = vand.u32 2147483648, %v535_v10  ;;  %v545_v29 = vand.u32 2147483647, %v535_v10  ;;  %vm541_vm12 = vweird.f32 %v535_v10 }
 0x2b9   : > { %v798_v22 = vpop.eup %797  ;;  %v548_v31 = vor.u32 1.1754944e-38, %v547_v27  ;;  %vm546_vm14 = vcmp.eq.f32.partialorder %v545_v29, 8.507059e+37 }
 0x2ba   : > { %v455_v23 = vsel %vm270_vm0, %v798_v22, 0.0 }
 0x2bb   : > { %456 = vadd.xlane.f32.xlu2 %v455_v23 }
 0x2bd   : > { %v800_v24 = vpop.eup %799 }
 0x2be   : > { %v537_v25 = vmul.f32 %v800_v24, %v535_v10  ;;  %vm542_vm11 = vweird.f32 %v800_v24 }
 0x2bf   : > { %vm543_vm13 = vmor %vm541_vm12, %vm542_vm11 }
 0x2c0   : > { %v538_v26 = vsub.f32 1.0, %v537_v25 }
 0x2c2   : > { %v539_v28 = vmul.f32 %v800_v24, %v538_v26 }
 0x2c4   : > { %v540_v30 = vadd.f32 %v800_v24, %v539_v28 }
 0x2c6   : > { %v544_v32 = vsel %vm543_vm13, %v800_v24, %v540_v30 }
 0x2c7   : > { %v549_v33 = vsel %vm546_vm14, %v548_v31, %v544_v32 }
 0x2c8   : > { %v550_v34 = vmul.f32 %v796_v14, %v549_v33 }
 0x2ca   : > { %733 = vst.msk [vmem:[%s1005_s8 + $0x18] sm:$0xff] %vm270_vm0, %v550_v34  ;;  %v553_v35 = vpack.c.bf16 %v550_v34, %v550_v34 }
 0x2cc   : > { %734 = vmatmul.msk.bf16.vlgmr.msrb.gmra.mxu2 %vm270_vm0, %v553_v35 }
 0x2ce   : > { %v477_v37 = vpop.permute.xlu1 %476 }
 0x2cf   : > { %v482_v41 = vsel %vm319_vm1, %v477_v37, 0 }
 0x2d3   : > { %398 = vrot.lane.b32.xlu2 %v1001_v50, %s867_s13  ;;  %s740_s13 = sshll.u32 %s925_s22, 5 }
 0x2d4   : > { %s601_s16 = scalar_lea.hbm %s1086_s5, %s740_s13 }
 0x2d5   : > { %s604_s23 = sshll.u32 %s601_s16, 4  ;;  %s605_s23 = int_to_ptr.hbm [resolvable:$true] %s604_s23 }
 0x2d6   : > { %s817_s26 = sshra.s32 %s605_s23, 4  ;;  %s818_s26 = int_to_ptr.hbm [resolvable:$true] %s817_s26 }
 0x2d7   : > { %s819_s7 = scalar_lea.hbm %s818_s26, 32  ;;  %p824_p0 = scmp.lt.s32.totalorder %s818_s26, %s1086_s5 }
 0x2d8   : > { %p820_p11 = scmp.ne.s32.totalorder %s818_s26, %s819_s7  ;;  %p825_p1 = scmp.lt.s32.totalorder %s823_s10, %s819_s7 }
 0x2da   : > { %p821_p12 = pnand %p820_p11, %p942_p5  ;;  %p826_p2 = por %p825_p1, %p824_p0 }
 0x2dc   : > { %p822_p13 = pneg %p821_p12 }
 0x2de   : > { %p827_p3 = pnand %p826_p2, %p822_p13 }
 0x32e   : > { %v457_v36 = vpop.xlane.xlu2 %456 }
 0x32f   : > { %801 = vrcp.f32 %v457_v36  ;;  %v469_v44 = vand.u32 2147483648, %v457_v36  ;;  %v467_v47 = vand.u32 2147483647, %v457_v36  ;;  %vm463_vm2 = vweird.f32 %v457_v36 }
 0x331   : > { %v470_v49 = vor.u32 1.1754944e-38, %v469_v44 }
 0x335   : > { %v802_v38 = vpop.eup %801 }
 0x336   : > { %v459_v39 = vmul.f32 %v802_v38, %v457_v36  ;;  %v399_v40 = vpop.permute.xlu2 %398  ;;  %vm464_vm15 = vweird.f32 %v802_v38 }
 0x337   : > { %v404_v42 = vsel %vm319_vm1, %v399_v40, 0  ;;  %vm465_vm3 = vmor %vm463_vm2, %vm464_vm15  ;;  %vm468_vm1 = vcmp.eq.f32.partialorder %v467_v47, 8.507059e+37 }
 0x338   : > { %v460_v43 = vsub.f32 1.0, %v459_v39  ;;  %413 = vmatpush.bf16.msra.mxu3 %v404_v42 }
 0x33a   : > { %v461_v46 = vmul.f32 %v802_v38, %v460_v43 }
 0x33b   : > { %728 = vmatmul.msk.bf16.vlgmr.msra.gmra.mxu3 %vm270_vm0, %v394_v45 }
 0x33c   : > { %491 = vmatpush.bf16.msrb.mxu3 %v482_v41  ;;  %v462_v48 = vadd.f32 %v802_v38, %v461_v46 }
 0x33e   : > { %v466_v50 = vsel %vm465_vm3, %v802_v38, %v462_v48 }
 0x33f   : > { %v471_v51 = vsel %vm468_vm1, %v470_v49, %v466_v50 }
 0x340   : > { %v472_v52 = vmul.f32 %v798_v22, %v471_v51 }
 0x342   : > { %730 = vst.msk [vmem:[%s1005_s8 + $0x10] sm:$0xff] %vm270_vm0, %v472_v52  ;;  %v475_v53 = vpack.c.bf16 %v472_v52, %v472_v52 }
 0x34b   : > { %731 = vmatmul.msk.bf16.vlgmr.msrb.gmra.mxu3 %vm270_vm0, %v475_v53 }
 0x34f   : > { %v571_v54 = vpop.f32.mrf.mxu2 }
 0x350   : > { %v575_v55 = vpack.c.bf16 %v571_v54, %v571_v54 }
 0x352   : > { %577 = vrot.lane.b32.xlu1 %v575_v55, %s870_s6 }
 0x357   : > { %v573_v56 = vpop.f32.mrf.mxu2 }
 0x3be   : > { %v415_v57 = vpop.f32.mrf.mxu3 }
 0x3bf   : > { %v419_v58 = vpack.c.bf16 %v415_v57, %v415_v57 }
 0x3c1   : > { %421 = vrot.lane.b32.xlu2 %v419_v58, %s871_s12 }
 0x3c6   : > { %v417_v59 = vpop.f32.mrf.mxu3 }
 0x3c7   : > { %830 = shalt.err (!%p827_p3)
}
 0x3c8   : > { %s872_s30 = smov 128   ;;  %s873_s8 = smov 16   ;;  %vm424_vm0 = vcmask 126016   ;;  %vm502_vm4 = vcmask 191616   ;;  %vm580_vm5 = vcmask 257216   ;;  %v578_v1 = vpop.permute.xlu1 %577 }
 0x3c9   : > { %741 = dma.vmem_to_hbm [thread:$0]  (%p942_p5), %s603_s17, 512, %s605_s23, %s587_s25, %s872_s30, %s872_s30, %s871_s12  }
 0x3ce   : > { %v493_v60 = vpop.f32.mrf.mxu3 }
 0x3cf   : > { %v497_v61 = vpack.c.bf16 %v493_v60, %v493_v60 }
 0x3d1   : > { %499 = vrot.lane.b32.xlu0 %v497_v61, %s873_s8 }
 0x3d6   : > { %v495_v62 = vpop.f32.mrf.mxu3 }
 0x41b   : > { %v422_v63 = vpop.permute.xlu2 %421 }
 0x41c   : > { %425 = vst.msk [vmem:[%s1020_s11] sm:$0xf] %vm424_vm0, %v422_v63 }
 0x443   : > { %v500_v0 = vpop.permute.xlu0 %499 }
 0x444   : > { %503 = vst.msk [vmem:[%s1020_s11] sm:$0xf] %vm502_vm4, %v500_v0 }
 0x445   : > { %581 = vst.msk [vmem:[%s1020_s11] sm:$0xf] %vm580_vm5, %v578_v1 }
 0x446 PF: > { %p747_p4 = scmp.ge.s32.totalorder %s865_s21, 2  ;;  %s626_s28 = sand.u32 1, %s853_s18  }
 0x447   : > { %s627_s12 = scalar_lea.sflag [#allocation3], %s626_s28 }
 0x448   : > { %p744_p5 = pnand %p747_p4, %p946_p6 }
 0x44a   : > { %p745_p7 = pneg %p744_p5 }
 0x44c   : > { %848 = dma.done.wait (%p745_p7), %s627_s12, 512  }
 0x44d   : > { %850 = vsyncadd (%p745_p7), %s627_s12, 4294966784  ;;  %p16_p8 = scmp.ge.s32.totalorder %s929_s24, 4   ;;  %s1089_s18 = smov %s857_s19 }
 0x44e   : > { %s1090_s19 = smov %s861_s20  ;;  %s1091_s20 = smov %s940_s27 }
 0x44f   : > { %s1092_s21 = smov %s929_s24  ;;  %18 = sbr.rel (!%p16_p8) target bundleno = 3 (0x3), region = 92 }
 0x454   :  { %633 = vsyncpa [#allocation3], 1 }
 0x455   :  { %635 = vsyncpa [#allocation3 + $0x1], 1 }

// kernel: decoder_forward.44
= control target key start
LH: loop header
LB: loop body
LE: loop exit
PB: predicated region body
PF: predicated region fallthrough
CT: control target
= control target key end

     0   :  { %9 = vsyncpa [#allocation3], 0  ;;  %s159_s18 = smov [#allocation2]   ;;  %s208_s0 = inlined_call_operand.vmem [shape: bf16[16,32], index: 0, kind: input, shape index: {}]   ;;  %s209_s1 = inlined_call_operand.vmem [shape: bf16[16,32], index: 1, kind: input, shape index: {}]   ;;  %s210_s2 = inlined_call_operand.vmem [shape: f32[1,32], index: 2, kind: input, shape index: {}]   ;;  %s211_s3 = inlined_call_operand.hbm [shape: f32[1,32], index: 3, kind: input, shape index: {}]   ;;  %s212_s4 = inlined_call_operand.vmem [shape: bf16[16,32], index: 4, kind: output, shape index: {}]  }
   0x1   :  { %s21_s17 = sshll.u32 %s211_s3, 4  ;;  %s23_s19 = sshll.u32 %s159_s18, 4  ;;  %s22_s17 = int_to_ptr.hbm [resolvable:$true] %s21_s17  ;;  %s24_s19 = int_to_ptr.vmem [resolvable:$true] %s23_s19 }
   0x2   :  { %26 = dma.hbm_to_vmem [thread:$0]  %s22_s17, 16, %s24_s19, [#allocation3]  }
   0x3   :  { %157 = dma.done.wait [#allocation3], 16  }
   0x4   :  { %158 = vsyncadd [#allocation3], 4294967280  ;;  %v116_v0 = vld [vmem:[%s208_s0] sm:$0xff]   ;;  %vm41_vm0 = vcmask 261120   ;;  %v160_v10 = vmov 32.0   ;;  %vm107_vm6 = vcmask 257024  }
   0x5   :  { %v120_v1 = vld [vmem:[%s209_s1] sm:$0xff]   ;;  %v117_v2 = vunpack.c.l.bf16 %v116_v0  ;;  %v118_v5 = vunpack.c.h.bf16 %v116_v0  ;;  %127 = vrcp.f32 %v160_v10 }
   0x6   :  { %v121_v3 = vunpack.c.l.bf16 %v120_v1  ;;  %v122_v6 = vunpack.c.h.bf16 %v120_v1  ;;  %v125_v41 = vld [vmem:[%s210_s2] ss:$0 sm:$0xff] }
   0x7   :  { %v126_v44 = vld [vmem:[#allocation2] ss:$0 sm:$0xff] }
   0x8   :  { %v39_v4 = vadd.f32 %v121_v3, %v117_v2  ;;  %v40_v8 = vadd.f32 %v122_v6, %v118_v5 }
   0xa   :  { %v42_v7 = vsel %vm41_vm0, %v39_v4, 0.0  ;;  %v45_v9 = vsel %vm41_vm0, %v40_v8, 0.0 }
   0xb   :  { %43 = vadd.xlane.f32.xlu0 %v42_v7  ;;  %v128_v11 = vpop.eup %127 }
   0xc   :  { %v49_v12 = vmul.f32 32.0, %v128_v11  ;;  %vm53_vm1 = vweird.f32 %v128_v11 }
   0xe   :  { %v50_v13 = vsub.f32 1.0, %v49_v12 }
  0x10   :  { %v51_v14 = vmul.f32 %v128_v11, %v50_v13 }
  0x12   :  { %v52_v15 = vadd.f32 %v128_v11, %v51_v14 }
  0x13   :  { %46 = vadd.xlane.f32.xlu0 %v45_v9 }
  0x14   :  { %v54_v16 = vsel %vm53_vm1, %v128_v11, %v52_v15 }
  0x7e   :  { %v44_v17 = vpop.xlane.xlu0 %43 }
  0x7f   :  { %v55_v18 = vmul.f32 %v54_v16, %v44_v17 }
  0x81   :  { %v57_v19 = vsub.f32 %v39_v4, %v55_v18 }
  0x83   :  { %v59_v20 = vmul.f32 %v57_v19, %v57_v19 }
  0x85   :  { %v61_v21 = vsel %vm41_vm0, %v59_v20, 0.0 }
  0x86   :  { %62 = vadd.xlane.f32.xlu1 %v61_v21  ;;  %v47_v22 = vpop.xlane.xlu0 %46 }
  0x87   :  { %v56_v23 = vmul.f32 %v54_v16, %v47_v22 }
  0x89   :  { %v58_v24 = vsub.f32 %v40_v8, %v56_v23 }
  0x8b   :  { %v60_v25 = vmul.f32 %v58_v24, %v58_v24 }
  0x8d   :  { %v64_v26 = vsel %vm41_vm0, %v60_v25, 0.0 }
  0x8e   :  { %65 = vadd.xlane.f32.xlu1 %v64_v26 }
  0xf9   :  { %v63_v27 = vpop.xlane.xlu1 %62 }
  0xfa   :  { %v67_v28 = vmul.f32 %v63_v27, %v54_v16 }
  0xfc   :  { %v69_v29 = vadd.f32 1e-05, %v67_v28 }
  0xfe   :  { %129 = vrsqrt.f32 %v69_v29  ;;  %vm77_vm3 = vweird.f32 %v69_v29 }
 0x101   :  { %v66_v30 = vpop.xlane.xlu1 %65 }
 0x102   :  { %v68_v31 = vmul.f32 %v66_v30, %v54_v16 }
 0x104   :  { %v130_v32 = vpop.eup %129  ;;  %v70_v33 = vadd.f32 1e-05, %v68_v31 }
 0x105   :  { %v72_v34 = vmul.f32 %v130_v32, %v69_v29  ;;  %vm78_vm2 = vweird.f32 %v130_v32 }
 0x106   :  { %131 = vrsqrt.f32 %v70_v33  ;;  %vm79_vm4 = vmor %vm77_vm3, %vm78_vm2  ;;  %vm87_vm7 = vweird.f32 %v70_v33 }
 0x107   :  { %v73_v35 = vmul.f32 %v130_v32, %v72_v34 }
 0x109   :  { %v74_v36 = vmul.f32 0.5, %v73_v35 }
 0x10b   :  { %v75_v37 = vsub.f32 1.5, %v74_v36 }
 0x10c   :  { %v132_v38 = vpop.eup %131 }
 0x10d   :  { %v76_v39 = vmul.f32 %v130_v32, %v75_v37  ;;  %v82_v40 = vmul.f32 %v132_v38, %v70_v33  ;;  %vm88_vm5 = vweird.f32 %v132_v38 }
 0x10e   :  { %vm89_vm8 = vmor %vm87_vm7, %vm88_vm5 }
 0x10f   :  { %v80_v42 = vsel %vm79_vm4, %v130_v32, %v76_v39  ;;  %v83_v43 = vmul.f32 %v132_v38, %v82_v40 }
 0x110   :  { %v91_v45 = vmul.f32 %v80_v42, %v57_v19 }
 0x111   :  { %v84_v46 = vmul.f32 0.5, %v83_v43 }
 0x112   :  { %v97_v47 = vmul.f32 %v125_v41, %v91_v45 }
 0x113   :  { %v85_v48 = vsub.f32 1.5, %v84_v46 }
 0x114   :  { %v103_v49 = vadd.f32 %v126_v44, %v97_v47 }
 0x115   :  { %v86_v50 = vmul.f32 %v132_v38, %v85_v48 }
 0x116   :  { %v105_v51 = vpack.c.bf16 %v103_v49, %v103_v49 }
 0x117   :  { %v90_v52 = vsel %vm89_vm8, %v132_v38, %v86_v50 }
 0x118   :  { %108 = vst.msk [vmem:[%s212_s4] sm:$0xf] %vm107_vm6, %v105_v51  ;;  %v92_v53 = vmul.f32 %v90_v52, %v58_v24 }
 0x11a   :  { %v98_v54 = vmul.f32 %v125_v41, %v92_v53 }
 0x11c   :  { %v104_v55 = vadd.f32 %v126_v44, %v98_v54 }
 0x11e   :  { %v106_v56 = vpack.c.bf16 %v104_v55, %v104_v55 }
 0x120   :  { %109 = vst.msk [vmem:[%s212_s4 + $0x4] sm:$0xf] %vm107_vm6, %v106_v56 }
 0x121   :  { %114 = vsyncpa [#allocation3], 1 }

// kernel: decoder_forward.45
= control target key start
LH: loop header
LB: loop body
LE: loop exit
PB: predicated region body
PF: predicated region fallthrough
CT: control target
= control target key end

     0   :  { %8 = vsyncpa [#allocation4], 0  ;;  %s217_s15 = smov [#allocation3]   ;;  %s274_s0 = inlined_call_operand.vmem [shape: bf16[16,128], index: 0, kind: input, shape index: {}]   ;;  %s275_s1 = inlined_call_operand.vmem [shape: bf16[128,128], index: 1, kind: input, shape index: {}]   ;;  %s276_s2 = inlined_call_operand.hbm [shape: f32[1,128], index: 2, kind: input, shape index: {}]   ;;  %s277_s3 = inlined_call_operand.vmem [shape: f32[16,128], index: 3, kind: output, shape index: {}]  }
   0x1   :  { %s18_s14 = sshll.u32 %s276_s2, 4  ;;  %s20_s16 = sshll.u32 %s217_s15, 4  ;;  %s19_s14 = int_to_ptr.hbm [resolvable:$true] %s18_s14  ;;  %s21_s16 = int_to_ptr.vmem [resolvable:$true] %s20_s16 }
   0x2   :  { %23 = dma.hbm_to_vmem [thread:$0]  %s19_s14, 16, %s21_s16, [#allocation4]  }
   0x3   :  { %215 = dma.done.wait [#allocation4], 16  }
   0x4   :  { %216 = vsyncadd [#allocation4], 4294967280  ;;  %v188_v0 = vld [vmem:[%s275_s1 + $0x38] sm:$0xff]  ;;  %v187_v1 = vld [vmem:[%s275_s1 + $0x30] sm:$0xff] }
   0x5   :  { %108 = vmatpush.bf16.msra.mxu0 %v188_v0  ;;  %v186_v2 = vld [vmem:[%s275_s1 + $0x28] sm:$0xff]  ;;  %v185_v3 = vld [vmem:[%s275_s1 + $0x20] sm:$0xff]  ;;  %v184_v4 = vld [vmem:[%s275_s1 + $0x18] sm:$0xff] }
   0x6   :  { %v183_v5 = vld [vmem:[%s275_s1 + $0x10] sm:$0xff]  ;;  %v182_v6 = vld [vmem:[%s275_s1 + $0x8] sm:$0xff]  ;;  %v181_v7 = vld [vmem:[%s275_s1] sm:$0xff] }
   0x7   :  { %v180_v8 = vld [vmem:[%s274_s0] sm:$0xff] }
   0x8   :  { %v190_v9 = vld [vmem:[#allocation3] ss:$0 sm:$0xff] }
   0x9   :  { %109 = vmatpush.bf16.msra.mxu0 %v187_v1 }
   0xd   :  { %110 = vmatpush.bf16.msra.mxu0 %v186_v2 }
  0x11   :  { %111 = vmatpush.bf16.msra.mxu0 %v185_v3 }
  0x15   :  { %112 = vmatpush.bf16.msra.mxu0 %v184_v4 }
  0x19   :  { %113 = vmatpush.bf16.msra.mxu0 %v183_v5 }
  0x1d   :  { %114 = vmatpush.bf16.msra.mxu0 %v182_v6 }
  0x21   :  { %115 = vmatpush.bf16.msra.mxu0 %v181_v7 }
  0x24   :  { %116 = vmatmul.bf16.vlgmr.msra.gmra.mxu0 %v180_v8 }
  0xa1   :  { %v117_v10 = vpop.f32.mrf.mxu0 }
  0xa2   :  { %v135_v11 = vadd.f32 %v190_v9, %v117_v10 }
  0xa4   :  { %137 = vst [vmem:[%s277_s3] sm:$0xff] %v135_v11 }
  0xa9   :  { %v119_v12 = vpop.f32.mrf.mxu0 }
  0xaa   :  { %v136_v13 = vadd.f32 %v190_v9, %v119_v12 }
  0xac   :  { %138 = vst [vmem:[%s277_s3 + $0x8] sm:$0xff] %v136_v13 }
  0xad   :  { %143 = vsyncpa [#allocation4], 1 }

</bundles_post_ra>
